<compile_context>
chip_gen: v7x
topology: tpu7x:2x2x1
jax: 0.10.0
libtpu: 0.0.40
codegen_flags: <defaults>
</compile_context>

<pallas_src>
import numpy as np
import jax
import jax.numpy as jnp
from jax import lax
from jax.experimental import pallas as pl
from jax.experimental.pallas import tpu as pltpu

NT = 7          # CRF tag count
NCONV = 100     # conv out channels
POOL = 99       # MaxPool1d window
CP = 128        # lane-padded channel width
NTPAD = 8       # sublane-padded tag count
NEG = -1.0e30   # "minus infinity" that stays finite under repeated adds


# ------------------- fused conv_s/conv_e (+ReLU+MaxPool) + classifier -------------------
def fused_dense(x_bf16, w_cat, b_pack, pool):
    """x_bf16: [B,S,768] bf16; w_cat: [768, 5*CP] bf16 with column blocks
    [conv_s tap0 | conv_s tap1 | conv_e tap0 | conv_e tap1 | cls], each padded to 128;
    b_pack: [3, CP] f32 (conv_s_b, conv_e_b, cls_b, zero-padded).
    Returns lane-padded f32 (xs_pool [B,Lp,CP], xe_pool [B,Lp,CP], logits [B,S,CP])."""
    B, S, Cin = x_bf16.shape
    Lc = S - 1
    Lp = Lc - pool + 1
    assert Lp >= 1
    ncols = w_cat.shape[1]
    assert ncols == 5 * CP

    def maxpool(conv):
        # conv: [Lc, CP]; window `pool`, stride 1 -> [Lp, CP].
        # shared = max over rows common to every window, combined with per-window edge rows.
        shared = jnp.max(conv[Lp - 1:pool, :], axis=0, keepdims=True)       # rows Lp-1..pool-1
        a = [None] * Lp                                                      # a[t] = max rows t..pool-1
        a[Lp - 1] = shared
        for t in range(Lp - 2, -1, -1):
            a[t] = jnp.maximum(conv[t:t + 1, :], a[t + 1])
        rows = [a[0]]
        sfx = None                                                           # max rows pool..pool+t-1
        for t in range(1, Lp):
            tail = conv[pool + t - 1:pool + t, :]
            sfx = tail if sfx is None else jnp.maximum(sfx, tail)
            rows.append(jnp.maximum(a[t], sfx))
        return jnp.concatenate(rows, axis=0)                                 # [Lp, CP]

    def kernel(x_ref, w_ref, b_ref, xs_ref, xe_ref, lg_ref):
        # one MXU pass covers both conv taps of both convs plus the classifier
        y = jnp.dot(x_ref[0], w_ref[...], preferred_element_type=jnp.float32)   # [S, 5*CP] f32
        lg_ref[0] = y[:, 4 * CP:5 * CP] + b_ref[2:3, :]
        conv_s = jnp.maximum(y[:Lc, 0:CP] + y[1:, CP:2 * CP] + b_ref[0:1, :], 0.0)
        conv_e = jnp.maximum(y[:Lc, 2 * CP:3 * CP] + y[1:, 3 * CP:4 * CP] + b_ref[1:2, :], 0.0)
        xs_ref[0] = maxpool(conv_s)
        xe_ref[0] = maxpool(conv_e)

    return pl.pallas_call(
        kernel,
        out_shape=(jax.ShapeDtypeStruct((B, Lp, CP), jnp.float32),
                   jax.ShapeDtypeStruct((B, Lp, CP), jnp.float32),
                   jax.ShapeDtypeStruct((B, S, CP), jnp.float32)),
        grid=(B,),
        in_specs=[pl.BlockSpec((1, S, Cin), lambda b: (b, 0, 0)),
                  pl.BlockSpec((Cin, ncols), lambda b: (0, 0)),
                  pl.BlockSpec((3, CP), lambda b: (0, 0))],
        out_specs=(pl.BlockSpec((1, Lp, CP), lambda b: (b, 0, 0)),
                   pl.BlockSpec((1, Lp, CP), lambda b: (b, 0, 0)),
                   pl.BlockSpec((1, S, CP), lambda b: (b, 0, 0))),
        compiler_params=pltpu.CompilerParams(dimension_semantics=("parallel",)),
    )(x_bf16, w_cat, b_pack)


# ------------------------------------ CRF Viterbi decode ------------------------------------
def crf_decode(logits_pad, mask, start_pad, trans_pad, end_pad):
    """torchcrf CRF.decode (batch_first). logits_pad [B,S,CP] f32 (lanes >= NT are 0),
    mask [B,S] {0,1} prefix masks (mask[:,0]==1). start/end [1,CP] and trans [NTPAD,CP]
    are NEG-padded. Returns [B,S] int32 tags, zero-padded past each sequence length."""
    B, S, _ = logits_pad.shape
    mask_i = mask.astype(jnp.int32)
    lens = jnp.sum(mask_i, axis=1).astype(jnp.int32)

    def kernel(emis_ref, mask_ref, lens_ref, start_ref, trans_ref, end_ref, o_ref, hist_ref):
        b = pl.program_id(0)

        p_iota = lax.broadcasted_iota(jnp.int32, (NTPAD, CP), 0)
        l_iota = lax.broadcasted_iota(jnp.int32, (NTPAD, CP), 1)
        eye = (p_iota == l_iota).astype(jnp.float32)                         # [NTPAD, CP]
        p_iota_f = p_iota.astype(jnp.float32)
        sub_col_f = lax.broadcasted_iota(jnp.int32, (NTPAD, 1), 0).astype(jnp.float32)
        lane_row = lax.broadcasted_iota(jnp.int32, (1, CP), 1)
        pos = lax.broadcasted_iota(jnp.int32, (1, 1, S), 2)

        def row_to_col(row):               # [1,CP] -> [NTPAD,1], col[p] = row[p]
            return jnp.sum(jnp.broadcast_to(row, (NTPAD, CP)) * eye, axis=1, keepdims=True)

        trans = trans_ref[...]                                               # [NTPAD, CP]
        emis0 = emis_ref[0, pl.ds(0, 1), :]                                  # [1, CP]
        score = row_to_col(start_ref[...] + emis0)                           # [NTPAD, 1]

        def step(i, col):
            cand = col + trans                                               # [NTPAD, CP]
            best = jnp.max(cand, axis=0, keepdims=True)                      # [1, CP]
            bp = jnp.min(jnp.where(cand == best, p_iota_f, float(NTPAD)),
                         axis=0, keepdims=True)                              # first argmax
            hist_ref[pl.ds(i, 1), :] = bp
            emis_i = emis_ref[0, pl.ds(i, 1), :]
            new_col = row_to_col(best + emis_i)
            m = mask_ref[b, i]
            return jnp.where(m != 0, new_col, col)

        score = lax.fori_loop(1, S, step, score)
        final = score + row_to_col(end_ref[...])                             # [NTPAD, 1]
        best_val = jnp.max(final, axis=0, keepdims=True)                     # [1, 1]
        btag = jnp.min(jnp.where(final == best_val, sub_col_f, float(NTPAD)),
                       axis=0, keepdims=True).astype(jnp.int32)              # [1, 1]

        last_pos = lens_ref[b] - 1
        out0 = jnp.where(pos == last_pos, btag, 0)                           # [1,1,S] int32
        cur0 = lane_row == btag                                              # one-hot [1,CP]

        def back(k, carry):
            cur_oh, out = carry
            si = last_pos - k
            hrow = hist_ref[pl.ds(si, 1), :]                                 # [1, CP] f32
            prev = jnp.max(jnp.where(cur_oh, hrow, -1.0),
                           axis=1, keepdims=True).astype(jnp.int32)          # [1, 1]
            out = jnp.where(pos == si - 1, prev, out)
            return (lane_row == prev, out)

        _, out_final = lax.fori_loop(0, last_pos, back, (cur0, out0))
        o_ref[...] = out_final

    tags = pl.pallas_call(
        kernel,
        out_shape=jax.ShapeDtypeStruct((B, 1, S), jnp.int32),
        grid=(B,),
        in_specs=[
            pl.BlockSpec((1, S, CP), lambda b: (b, 0, 0)),            # emissions (lane-padded)
            pl.BlockSpec(memory_space=pltpu.MemorySpace.SMEM),        # mask [B,S]
            pl.BlockSpec(memory_space=pltpu.MemorySpace.SMEM),        # lens [B]
            pl.BlockSpec((1, CP), lambda b: (0, 0)),                  # start (NEG-padded)
            pl.BlockSpec((NTPAD, CP), lambda b: (0, 0)),              # transitions (NEG-padded)
            pl.BlockSpec((1, CP), lambda b: (0, 0)),                  # end (NEG-padded)
        ],
        out_specs=pl.BlockSpec((1, 1, S), lambda b: (b, 0, 0)),
        scratch_shapes=[pltpu.VMEM((S, CP), jnp.float32)],            # backpointer rows
        compiler_params=pltpu.CompilerParams(dimension_semantics=("parallel",)),
    )(logits_pad, mask_i, lens, start_pad, trans_pad, end_pad)
    return tags[:, 0, :]


# ---------------------------------------- forward ----------------------------------------
def prepare_params(params):
    """One-time parameter preprocessing (done once, outside the per-call forward):
    fused bf16 weight matrix, packed f32 biases, lane/sublane-padded CRF tensors."""
    def pad_cols(w):
        return jnp.pad(w, ((0, 0), (0, CP - w.shape[1])))
    blocks = [params["conv_s_w"][:, :, 0].T, params["conv_s_w"][:, :, 1].T,   # torch [out,in,k]
              params["conv_e_w"][:, :, 0].T, params["conv_e_w"][:, :, 1].T,
              params["cls_w"]]
    w_cat = jnp.concatenate([pad_cols(w) for w in blocks], axis=1).astype(jnp.bfloat16)
    def pad_row(v):
        return jnp.pad(v, (0, CP - v.shape[0]))[None, :]
    b_pack = jnp.concatenate([pad_row(params["conv_s_b"]), pad_row(params["conv_e_b"]),
                              pad_row(params["cls_b"])], axis=0).astype(jnp.float32)
    start_pad = jnp.full((1, CP), NEG, jnp.float32).at[0, :NT].set(params["crf_start"])
    end_pad = jnp.full((1, CP), NEG, jnp.float32).at[0, :NT].set(params["crf_end"])
    trans_pad = jnp.full((NTPAD, CP), NEG, jnp.float32).at[:NT, :NT].set(params["crf_trans"])
    return dict(params, w_cat=w_cat, b_pack=b_pack, start_pad=start_pad,
                end_pad=end_pad, trans_pad=trans_pad)


def token_ote2ts3_forward(pp, input_ids, attention_mask, token_type_ids):
    # TODO(synk): the pretrained BERT encoder has no in-script Pallas equivalent; it is replaced
    # by a deterministic (word + token-type) embedding lookup producing the [B,S,768]
    # sequence_output. Dropouts are eval-mode identities.
    seq_out = (pp["word_emb"][input_ids] + pp["type_emb"][token_type_ids]).astype(jnp.float32)

    # Single fused pallas_call: conv_s/conv_e (k=2) + ReLU + MaxPool1d(99,1) and the token
    # classifier, all derived from one bf16 [S,768]x[768,640] MXU matmul per batch element.
    xs_pad, xe_pad, logits_pad = fused_dense(seq_out.astype(jnp.bfloat16),
                                             pp["w_cat"], pp["b_pack"], pool=POOL)
    xs = jnp.transpose(xs_pad[:, :, :NCONV], (0, 2, 1))    # PyTorch NCL [B, 100, L_pool]
    xe = jnp.transpose(xe_pad[:, :, :NCONV], (0, 2, 1))
    logits = logits_pad[:, :, :NT]                         # [B, S, 7]

    # use_crf=True, labels=None  ->  self.crf.decode(logits, attention_mask.byte())
    # TODO(synk): torchcrf returns variable-length Python lists; we return a zero-padded [B,S] array.
    tags = crf_decode(logits_pad, attention_mask, pp["start_pad"], pp["trans_pad"], pp["end_pad"])
    return tags, logits, xs, xe, seq_out


# ------------------------------------ plain references ------------------------------------
def conv_pool_ref_np(x, w_oik, b, pool):
    x = np.asarray(x, np.float64)
    w = np.asarray(w_oik, np.float64)
    b = np.asarray(b, np.float64)
    conv = (np.einsum('bsc,oc->bso', x[:, :-1, :], w[:, :, 0])
            + np.einsum('bsc,oc->bso', x[:, 1:, :], w[:, :, 1]) + b[None, None, :])
    conv = np.maximum(conv, 0.0)
    Lp = conv.shape[1] - pool + 1
    out = np.stack([conv[:, t:t + pool, :].max(axis=1) for t in range(Lp)], axis=1)
    return np.transpose(out, (0, 2, 1))          # [B, Cout, Lp] (PyTorch NCL)


def viterbi_ref_np(logits, mask, start, trans, end):
    logits = np.asarray(logits, np.float32); mask = np.asarray(mask, np.int32)
    start = np.asarray(start, np.float32); trans = np.asarray(trans, np.float32)
    end = np.asarray(end, np.float32)
    B, S, NT_ = logits.shape
    out = np.zeros((B, S), np.int32)
    for b in range(B):
        L = int(mask[b].sum())
        score = (start + logits[b, 0]).astype(np.float32)
        hist = np.zeros((S, NT_), np.int32)
        for i in range(1, S):
            old = score.copy(); new = score.copy()
            for n in range(NT_):
                best = np.float32(old[0] + trans[0, n]); bidx = 0
                for p in range(1, NT_):
                    cand = np.float32(old[p] + trans[p, n])
                    if cand > best:
                        best, bidx = cand, p
                hist[i, n] = bidx
                if mask[b, i] != 0:
                    new[n] = np.float32(best + logits[b, i, n])
            score = new
        score = (score + end).astype(np.float32)
        best = score[0]; btag = 0
        for t in range(1, NT_):
            if score[t] > best:
                best, btag = score[t], t
        pos = L - 1
        out[b, pos] = btag
        cur = btag
        for k in range(pos):
            si = pos - k
            cur = int(hist[si, cur])
            out[b, si - 1] = cur
    return out


if __name__ == "__main__":
    B, S, HID, VOCAB = 2, 104, 768, 30
    key = jax.random.PRNGKey(0)
    ks = jax.random.split(key, 13)

    input_ids = jax.random.randint(ks[0], (B, S), 0, VOCAB, dtype=jnp.int32)
    token_type_ids = jnp.zeros((B, S), jnp.int32)
    lengths = jnp.array([S, S - 7], jnp.int32)
    attention_mask = (jnp.arange(S)[None, :] < lengths[:, None]).astype(jnp.int32)

    params = dict(
        word_emb=0.1 * jax.random.normal(ks[1], (VOCAB, HID), jnp.float32),
        type_emb=0.02 * jax.random.normal(ks[2], (2, HID), jnp.float32),
        conv_s_w=0.02 * jax.random.normal(ks[3], (NCONV, HID, 2), jnp.float32),  # torch Conv1d [out,in,k]
        conv_s_b=0.02 * jax.random.normal(ks[4], (NCONV,), jnp.float32),
        conv_e_w=0.02 * jax.random.normal(ks[5], (NCONV, HID, 2), jnp.float32),
        conv_e_b=0.02 * jax.random.normal(ks[6], (NCONV,), jnp.float32),
        cls_w=0.05 * jax.random.normal(ks[7], (HID, NT), jnp.float32),
        cls_b=0.05 * jax.random.normal(ks[8], (NT,), jnp.float32),
        crf_start=jax.random.uniform(ks[9], (NT,), jnp.float32, -0.1, 0.1),
        crf_end=jax.random.uniform(ks[10], (NT,), jnp.float32, -0.1, 0.1),
        crf_trans=jax.random.uniform(ks[11], (NT, NT), jnp.float32, -0.1, 0.1),
    )
    pp = prepare_params(params)

    tags, logits, xs, xe, seq_out = token_ote2ts3_forward(
        pp, input_ids, attention_mask, token_type_ids)
    jax.block_until_ready((tags, logits, xs, xe))

    Lp = (S - 1) - POOL + 1
    assert tags.shape == (B, S) and tags.dtype == jnp.int32
    assert logits.shape == (B, S, NT)
    assert xs.shape == (B, NCONV, Lp) and xe.shape == (B, NCONV, Lp)
    assert bool(jnp.all(jnp.isfinite(logits))) and bool(jnp.all(jnp.isfinite(xs)))

    # classifier check (bf16 MXU inputs, f32 accumulation -> loose tolerance)
    ref_logits = (np.asarray(seq_out, np.float64) @ np.asarray(params["cls_w"], np.float64)
                  + np.asarray(params["cls_b"], np.float64))
    assert np.allclose(np.asarray(logits), ref_logits, rtol=5e-2, atol=1e-2)

    ref_xs = conv_pool_ref_np(seq_out, params["conv_s_w"], params["conv_s_b"], POOL)
    assert np.allclose(np.asarray(xs), ref_xs, rtol=5e-2, atol=1e-2)
    ref_xe = conv_pool_ref_np(seq_out, params["conv_e_w"], params["conv_e_b"], POOL)
    assert np.allclose(np.asarray(xe), ref_xe, rtol=5e-2, atol=1e-2)

    # CRF decode check (same logits feed both paths -> exact tag equality expected)
    ref_tags = viterbi_ref_np(logits, attention_mask, params["crf_start"],
                              params["crf_trans"], params["crf_end"])
    assert np.array_equal(np.asarray(tags), ref_tags)

    print("KERNEL_OK")
</pallas_src>

<mosaic_0001>
module attributes {stable_mosaic.version = 11 : i64} {
  func.func @kernel(%arg0: i32, %arg1: memref<1x104x768xbf16, #tpu.memory_space<vmem>>, %arg2: memref<768x640xbf16, #tpu.memory_space<vmem>>, %arg3: memref<3x128xf32, #tpu.memory_space<vmem>>, %arg4: memref<1x5x128xf32, #tpu.memory_space<vmem>>, %arg5: memref<1x5x128xf32, #tpu.memory_space<vmem>>, %arg6: memref<1x104x128xf32, #tpu.memory_space<vmem>>) attributes {dimension_semantics = [#tpu.dimension_semantics<parallel>], iteration_bounds = array<i64: 2>, scalar_prefetch = 0 : i64, scratch_operands = 0 : i64, tpu.core_type = #tpu.core_type<tc>, window_params = [{transform_indices = @transform_0, window_bounds = array<i64: 1, 104, 768>}, {pipeline_mode = #tpu.pipeline_mode<synchronous>, transform_indices = @transform_1, window_bounds = array<i64: 768, 640>}, {pipeline_mode = #tpu.pipeline_mode<synchronous>, transform_indices = @transform_2, window_bounds = array<i64: 3, 128>}, {transform_indices = @transform_3, window_bounds = array<i64: 1, 5, 128>}, {transform_indices = @transform_4, window_bounds = array<i64: 1, 5, 128>}, {transform_indices = @transform_5, window_bounds = array<i64: 1, 104, 128>}]} {
    %c0 = arith.constant 0 : index
    %c0_0 = arith.constant 0 : index
    %c0_1 = arith.constant 0 : index
    %0 = vector.load %arg1[%c0, %c0_0, %c0_1] : memref<1x104x768xbf16, #tpu.memory_space<vmem>>, vector<1x104x768xbf16>
    %1 = vector.shape_cast %0 : vector<1x104x768xbf16> to vector<104x768xbf16>
    %c0_2 = arith.constant 0 : index
    %c0_3 = arith.constant 0 : index
    %2 = vector.load %arg2[%c0_2, %c0_3] : memref<768x640xbf16, #tpu.memory_space<vmem>>, vector<768x640xbf16>
    %cst = arith.constant dense<0.000000e+00> : vector<104x640xf32>
    %3 = tpu.matmul %1, %2, %cst {dimension_numbers = #tpu.dot_dimension_numbers<[1], [0], [0], [1], [0, 0, 1, 1], [], []>} : vector<104x768xbf16>, vector<768x640xbf16>, vector<104x640xf32> -> vector<104x640xf32>
    %4 = vector.extract_strided_slice %3 {offsets = [0, 512], sizes = [104, 128], strides = [1, 1]} : vector<104x640xf32> to vector<104x128xf32>
    %c2 = arith.constant 2 : index
    %c0_4 = arith.constant 0 : index
    %5 = vector.load %arg3[%c2, %c0_4] : memref<3x128xf32, #tpu.memory_space<vmem>>, vector<1x128xf32>
    %6 = vector.broadcast %5 : vector<1x128xf32> to vector<104x128xf32>
    %7 = arith.addf %4, %6 : vector<104x128xf32>
    %c0_5 = arith.constant 0 : index
    %c0_6 = arith.constant 0 : index
    %c0_7 = arith.constant 0 : index
    %8 = vector.load %arg6[%c0_5, %c0_6, %c0_7] : memref<1x104x128xf32, #tpu.memory_space<vmem>>, vector<1x104x128xf32>
    %9 = vector.shape_cast %8 : vector<1x104x128xf32> to vector<104x128xf32>
    %10 = vector.shape_cast %7 : vector<104x128xf32> to vector<1x104x128xf32>
    tpu.vector_store %arg6[%c0_5, %c0_6, %c0_7], %10 {strides = array<i32>} : memref<1x104x128xf32, #tpu.memory_space<vmem>>, vector<1x104x128xf32>,
    %11 = vector.extract_strided_slice %3 {offsets = [0, 0], sizes = [103, 128], strides = [1, 1]} : vector<104x640xf32> to vector<103x128xf32>
    %12 = vector.extract_strided_slice %3 {offsets = [1, 128], sizes = [103, 128], strides = [1, 1]} : vector<104x640xf32> to vector<103x128xf32>
    %13 = arith.addf %11, %12 : vector<103x128xf32>
    %c0_8 = arith.constant 0 : index
    %c0_9 = arith.constant 0 : index
    %14 = vector.load %arg3[%c0_8, %c0_9] : memref<3x128xf32, #tpu.memory_space<vmem>>, vector<1x128xf32>
    %15 = vector.broadcast %14 : vector<1x128xf32> to vector<103x128xf32>
    %16 = arith.addf %13, %15 : vector<103x128xf32>
    %cst_10 = arith.constant 0.000000e+00 : f32
    %17 = vector.broadcast %cst_10 : f32 to vector<103x128xf32>
    %18 = arith.maximumf %16, %17 : vector<103x128xf32>
    %19 = vector.extract_strided_slice %3 {offsets = [0, 256], sizes = [103, 128], strides = [1, 1]} : vector<104x640xf32> to vector<103x128xf32>
    %20 = vector.extract_strided_slice %3 {offsets = [1, 384], sizes = [103, 128], strides = [1, 1]} : vector<104x640xf32> to vector<103x128xf32>
    %21 = arith.addf %19, %20 : vector<103x128xf32>
    %c1 = arith.constant 1 : index
    %c0_11 = arith.constant 0 : index
    %22 = vector.load %arg3[%c1, %c0_11] : memref<3x128xf32, #tpu.memory_space<vmem>>, vector<1x128xf32>
    %23 = vector.broadcast %22 : vector<1x128xf32> to vector<103x128xf32>
    %24 = arith.addf %21, %23 : vector<103x128xf32>
    %cst_12 = arith.constant 0.000000e+00 : f32
    %25 = vector.broadcast %cst_12 : f32 to vector<103x128xf32>
    %26 = arith.maximumf %24, %25 : vector<103x128xf32>
    %27 = vector.extract_strided_slice %18 {offsets = [4, 0], sizes = [95, 128], strides = [1, 1]} : vector<103x128xf32> to vector<95x128xf32>
    %cst_13 = arith.constant dense<0xFF800000> : vector<128xf32>
    %28 = vector.multi_reduction <maximumf>, %27, %cst_13 [0] : vector<95x128xf32> to vector<128xf32>
    %29 = vector.shape_cast %28 : vector<128xf32> to vector<1x128xf32>
    %30 = vector.extract_strided_slice %18 {offsets = [3, 0], sizes = [1, 128], strides = [1, 1]} : vector<103x128xf32> to vector<1x128xf32>
    %31 = arith.maximumf %30, %29 : vector<1x128xf32>
    %32 = vector.extract_strided_slice %18 {offsets = [2, 0], sizes = [1, 128], strides = [1, 1]} : vector<103x128xf32> to vector<1x128xf32>
    %33 = arith.maximumf %32, %31 : vector<1x128xf32>
    %34 = vector.extract_strided_slice %18 {offsets = [1, 0], sizes = [1, 128], strides = [1, 1]} : vector<103x128xf32> to vector<1x128xf32>
    %35 = arith.maximumf %34, %33 : vector<1x128xf32>
    %36 = vector.extract_strided_slice %18 {offsets = [0, 0], sizes = [1, 128], strides = [1, 1]} : vector<103x128xf32> to vector<1x128xf32>
    %37 = arith.maximumf %36, %35 : vector<1x128xf32>
    %38 = vector.extract_strided_slice %18 {offsets = [99, 0], sizes = [1, 128], strides = [1, 1]} : vector<103x128xf32> to vector<1x128xf32>
    %39 = arith.maximumf %35, %38 : vector<1x128xf32>
    %40 = vector.extract_strided_slice %18 {offsets = [100, 0], sizes = [1, 128], strides = [1, 1]} : vector<103x128xf32> to vector<1x128xf32>
    %41 = arith.maximumf %38, %40 : vector<1x128xf32>
    %42 = arith.maximumf %33, %41 : vector<1x128xf32>
    %43 = vector.extract_strided_slice %18 {offsets = [101, 0], sizes = [1, 128], strides = [1, 1]} : vector<103x128xf32> to vector<1x128xf32>
    %44 = arith.maximumf %41, %43 : vector<1x128xf32>
    %45 = arith.maximumf %31, %44 : vector<1x128xf32>
    %46 = vector.extract_strided_slice %18 {offsets = [102, 0], sizes = [1, 128], strides = [1, 1]} : vector<103x128xf32> to vector<1x128xf32>
    %47 = arith.maximumf %44, %46 : vector<1x128xf32>
    %48 = arith.maximumf %29, %47 : vector<1x128xf32>
    %49 = tpu.concatenate %37, %39, %42, %45, %48 in 0 : vector<1x128xf32>, vector<1x128xf32>, vector<1x128xf32>, vector<1x128xf32>, vector<1x128xf32> -> vector<5x128xf32>
    %c0_14 = arith.constant 0 : index
    %c0_15 = arith.constant 0 : index
    %c0_16 = arith.constant 0 : index
    %50 = vector.load %arg4[%c0_14, %c0_15, %c0_16] : memref<1x5x128xf32, #tpu.memory_space<vmem>>, vector<1x5x128xf32>
    %51 = vector.shape_cast %50 : vector<1x5x128xf32> to vector<5x128xf32>
    %52 = vector.shape_cast %49 : vector<5x128xf32> to vector<1x5x128xf32>
    tpu.vector_store %arg4[%c0_14, %c0_15, %c0_16], %52 {strides = array<i32>} : memref<1x5x128xf32, #tpu.memory_space<vmem>>, vector<1x5x128xf32>,
    %53 = vector.extract_strided_slice %26 {offsets = [4, 0], sizes = [95, 128], strides = [1, 1]} : vector<103x128xf32> to vector<95x128xf32>
    %cst_17 = arith.constant dense<0xFF800000> : vector<128xf32>
    %54 = vector.multi_reduction <maximumf>, %53, %cst_17 [0] : vector<95x128xf32> to vector<128xf32>
    %55 = vector.shape_cast %54 : vector<128xf32> to vector<1x128xf32>
    %56 = vector.extract_strided_slice %26 {offsets = [3, 0], sizes = [1, 128], strides = [1, 1]} : vector<103x128xf32> to vector<1x128xf32>
    %57 = arith.maximumf %56, %55 : vector<1x128xf32>
    %58 = vector.extract_strided_slice %26 {offsets = [2, 0], sizes = [1, 128], strides = [1, 1]} : vector<103x128xf32> to vector<1x128xf32>
    %59 = arith.maximumf %58, %57 : vector<1x128xf32>
    %60 = vector.extract_strided_slice %26 {offsets = [1, 0], sizes = [1, 128], strides = [1, 1]} : vector<103x128xf32> to vector<1x128xf32>
    %61 = arith.maximumf %60, %59 : vector<1x128xf32>
    %62 = vector.extract_strided_slice %26 {offsets = [0, 0], sizes = [1, 128], strides = [1, 1]} : vector<103x128xf32> to vector<1x128xf32>
    %63 = arith.maximumf %62, %61 : vector<1x128xf32>
    %64 = vector.extract_strided_slice %26 {offsets = [99, 0], sizes = [1, 128], strides = [1, 1]} : vector<103x128xf32> to vector<1x128xf32>
    %65 = arith.maximumf %61, %64 : vector<1x128xf32>
    %66 = vector.extract_strided_slice %26 {offsets = [100, 0], sizes = [1, 128], strides = [1, 1]} : vector<103x128xf32> to vector<1x128xf32>
    %67 = arith.maximumf %64, %66 : vector<1x128xf32>
    %68 = arith.maximumf %59, %67 : vector<1x128xf32>
    %69 = vector.extract_strided_slice %26 {offsets = [101, 0], sizes = [1, 128], strides = [1, 1]} : vector<103x128xf32> to vector<1x128xf32>
    %70 = arith.maximumf %67, %69 : vector<1x128xf32>
    %71 = arith.maximumf %57, %70 : vector<1x128xf32>
    %72 = vector.extract_strided_slice %26 {offsets = [102, 0], sizes = [1, 128], strides = [1, 1]} : vector<103x128xf32> to vector<1x128xf32>
    %73 = arith.maximumf %70, %72 : vector<1x128xf32>
    %74 = arith.maximumf %55, %73 : vector<1x128xf32>
    %75 = tpu.concatenate %63, %65, %68, %71, %74 in 0 : vector<1x128xf32>, vector<1x128xf32>, vector<1x128xf32>, vector<1x128xf32>, vector<1x128xf32> -> vector<5x128xf32>
    %c0_18 = arith.constant 0 : index
    %c0_19 = arith.constant 0 : index
    %c0_20 = arith.constant 0 : index
    %76 = vector.load %arg5[%c0_18, %c0_19, %c0_20] : memref<1x5x128xf32, #tpu.memory_space<vmem>>, vector<1x5x128xf32>
    %77 = vector.shape_cast %76 : vector<1x5x128xf32> to vector<5x128xf32>
    %78 = vector.shape_cast %75 : vector<5x128xf32> to vector<1x5x128xf32>
    tpu.vector_store %arg5[%c0_18, %c0_19, %c0_20], %78 {strides = array<i32>} : memref<1x5x128xf32, #tpu.memory_space<vmem>>, vector<1x5x128xf32>,
    return
  }
  func.func @transform_0(%arg0: i32) -> (i32, i32, i32) {
    %c0_i32 = arith.constant 0 : i32
    %c0_i32_0 = arith.constant 0 : i32
    %c0_i32_1 = arith.constant 0 : i32
    return %arg0, %c0_i32, %c0_i32_0 : i32, i32, i32
  }
  func.func @transform_1(%arg0: i32) -> (i32, i32) {
    %c0_i32 = arith.constant 0 : i32
    %c0_i32_0 = arith.constant 0 : i32
    %c0_i32_1 = arith.constant 0 : i32
    return %c0_i32, %c0_i32_0 : i32, i32
  }
  func.func @transform_2(%arg0: i32) -> (i32, i32) {
    %c0_i32 = arith.constant 0 : i32
    %c0_i32_0 = arith.constant 0 : i32
    %c0_i32_1 = arith.constant 0 : i32
    return %c0_i32, %c0_i32_0 : i32, i32
  }
  func.func @transform_3(%arg0: i32) -> (i32, i32, i32) {
    %c0_i32 = arith.constant 0 : i32
    %c0_i32_0 = arith.constant 0 : i32
    %c0_i32_1 = arith.constant 0 : i32
    return %arg0, %c0_i32, %c0_i32_0 : i32, i32, i32
  }
  func.func @transform_4(%arg0: i32) -> (i32, i32, i32) {
    %c0_i32 = arith.constant 0 : i32
    %c0_i32_0 = arith.constant 0 : i32
    %c0_i32_1 = arith.constant 0 : i32
    return %arg0, %c0_i32, %c0_i32_0 : i32, i32, i32
  }
  func.func @transform_5(%arg0: i32) -> (i32, i32, i32) {
    %c0_i32 = arith.constant 0 : i32
    %c0_i32_0 = arith.constant 0 : i32
    %c0_i32_1 = arith.constant 0 : i32
    return %arg0, %c0_i32, %c0_i32_0 : i32, i32, i32
  }
}

</mosaic_0001>

<bundles_post_ra>
// kernel: tpu_custom_call.1
= control target key start
LH: loop header
LB: loop body
LE: loop exit
PB: predicated region body
PF: predicated region fallthrough
CT: control target
= control target key end

     0   :  { %11 = vsyncpa [#allocation3], 0  ;;  %s5299_s0 = inlined_call_operand.hbm [shape: bf16[2,104,768], index: 0, kind: input, shape index: {}]   ;;  %s5300_s1 = inlined_call_operand.hbm [shape: bf16[768,640], index: 1, kind: input, shape index: {}]   ;;  %s5301_s2 = inlined_call_operand.vmem [shape: f32[3,128], index: 2, kind: input, shape index: {}]   ;;  %s5302_s3 = inlined_call_operand.vmem [shape: f32[2,5,128], index: 3, kind: output, shape index: {0}]   ;;  %s5303_s4 = inlined_call_operand.vmem [shape: f32[2,5,128], index: 4, kind: output, shape index: {1}]   ;;  %s5304_s5 = inlined_call_operand.hbm [shape: f32[2,104,128], index: 5, kind: output, shape index: {2}]  }
   0x1   :  { %13 = vsyncpa [#allocation3 + $0x1], 0 }
   0x2   :  { %14 = vsyncpa [#allocation6], 0 }
   0x3   :  { %15 = vsyncpa [#allocation4], 0 }
   0x4   :  { %17 = vsyncpa [#allocation4 + $0x1], 0  ;;  %s4656_s18 = smov 0   ;;  %s4658_s19 = smov 0  }
   0x5   :  { %s4660_s20 = smov 0   ;;  %s4662_s21 = smov 0  }
   0x6 LB: > { %s4677_s22 = sadd.s32 4294967295, %s4615_s21   ;;  %s3428_s23 = sadd.s32 4294967294, %s4615_s21   ;;  %s4615_s21 = sphi %s4662_s21, %s5324_s21   ;;  %s4611_s20 = sphi %s4660_s20, %s5323_s20   ;;  %s4607_s19 = sphi %s4658_s19, %s5322_s19   ;;  %s4603_s18 = sphi %s4656_s18, %s5321_s18  }
   0x7   : > { %p43_p0 = scmp.ne.s32.totalorder %s4607_s19, %s4603_s18  ;;  %p5305_p1 = scmp.eq.s32.totalorder %s4677_s22, 0 }
   0x8   : > { %p167_p3 = scmp.eq.s32.totalorder %s3428_s23, 1  ;;  %p3429_p5 = scmp.ge.s32.totalorder %s4615_s21, 1 }
   0x9   : > { %p4686_p4 = por %p5305_p1, %p43_p0  ;;  %p174_p7 = scmp.lt.s32.totalorder %s4615_s21, 3 }
   0xa   : > { %p4691_p6 = por %p167_p3, %p43_p0  ;;  %s4617_s27 = smov [#allocation5]  }
   0xb   : > { %s5308_s24 = scalar_select %p4686_p4, 1, 0 }
   0xc   : > { %s5309_s25 = scalar_select %p4691_p6, 1, 0 }
   0xd   : > { %p4696_p8 = pnand %p3429_p5, %p174_p7  ;;  %s186_s28 = sshll.u32 %s4617_s27, 4  ;;  %s4700_s28 = int_to_ptr.vmem [resolvable:$true] %s186_s28 }
   0xe   : > { %s4712_s30 = sadd.s32 1, %s4615_s21   ;;  %s30_s6 = sadd.s32 1, %s4611_s20 }
   0xf   : > { %s5310_s26 = scalar_select %p4696_p8, 1, 0 }
  0x10   : > { %p4024_p9 = pneg %p4696_p8  ;;  %s27_s7 = ssub.s32 %s4615_s21, %s4712_s30 }
  0x11   : > { %s4487_s10 = scalar_lea.hbm %s5300_s1, 30720 }
  0x12   : > { %p4707_p11 = pnand %p4024_p9, %p5305_p1  ;;  %p4488_p12 = scmp.ne.s32.totalorder %s5300_s1, %s4487_s10 }
  0x13   : > { %p4494_p5 = scmp.lt.u32.totalorder %s4487_s10, %s5300_s1 }
  0x14   : > { %p4489_p13 = pneg %p4707_p11 }
  0x16   : > { %p4490_p0 = pnand %p4489_p13, %p4488_p12 }
  0x18   : > { %p4491_p3 = pneg %p4490_p0 }
  0x1a   : > { %p4496_p7 = pnand %p4494_p5, %p4491_p3 }
  0x1c   : > { %4499 = shalt.err (!%p4496_p7)
}
  0x1d   : > { %s4500_s15 = scalar_lea.vmem %s4700_s28, 30720  ;;  %p4508_p2 = scmp.lt.s32.totalorder %s4700_s28, %s4700_s28 }
  0x1e   : > { %p4501_p9 = scmp.ne.s32.totalorder %s4700_s28, %s4500_s15  ;;  %p4509_p6 = scmp.lt.s32.totalorder %s4500_s15, %s4500_s15 }
  0x20   : > { %p4503_p10 = pnand %p4501_p9, %p4489_p13  ;;  %p4510_p4 = por %p4509_p6, %p4508_p2 }
  0x22   : > { %p4504_p1 = pneg %p4503_p10 }
  0x24   : > { %p4511_p8 = pnand %p4510_p4, %p4504_p1 }
  0x26   : > { %4514 = shalt.err (!%p4511_p8)
}
  0x27   : > { %s4618_s16 = smov 320   ;;  %s4619_s17 = smov 20  }
  0x28   : > { %4027 = dma.hbm_to_vmem [thread:$0]  (!%p4707_p11), %s5300_s1, 30720, %s4700_s28, [#allocation6], %s4618_s16, %s4618_s16, %s4619_s17  }
  0x29   : > { %p28_p2 = scmp.eq.s32.totalorder %s27_s7, 0  ;;  %p37_p1 = scmp.ne.s32.totalorder %s4611_s20, %s4607_s19 }
  0x2a   : > { %p38_p4 = scmp.eq.s32.totalorder %s4615_s21, 0  ;;  %p4037_p6 = scmp.lt.s32.totalorder %s4615_s21, 2 }
  0x2b   : > { %s4743_s8 = scalar_select %p28_p2, %s4611_s20, %s30_s6  }
  0x2c   : > { %p39_p8 = por %p38_p4, %p37_p1  ;;  %p5312_p10 = scmp.eq.s32.totalorder %s4677_s22, 1 }
  0x2d   : > { %s203_s10 = sand.u32 1, %s4611_s20   ;;  %s4012_s11 = smul.u32 4992, %s4615_s21 }
  0x2e   : > { %p4747_p12 = por %p5312_p10, %p37_p1  ;;  %s4011_s12 = smul.u32 312, %s203_s10 }
  0x2f   : > { %s4756_s14 = scalar_lea.hbm %s5299_s0, %s4012_s11  ;;  %p4758_p11 = pnand %p4037_p6, %p39_p8 }
  0x30   : > { %s207_s6 = scalar_lea.vmem [#allocation2], %s4011_s12  ;;  %s4764_s15 = scalar_lea.sflag [#allocation3], %s203_s10 }
  0x31   : > { %s214_s7 = sshll.u32 %s207_s6, 4  ;;  %s4515_s16 = scalar_lea.hbm %s4756_s14, 4992  ;;  %s4762_s7 = int_to_ptr.vmem [resolvable:$true] %s214_s7 }
  0x32   : > { %p4516_p13 = scmp.ne.s32.totalorder %s4756_s14, %s4515_s16  ;;  %p4517_p0 = pneg %p4758_p11 }
  0x33   : > { %s4520_s27 = scalar_lea.hbm %s5299_s0, 9984  ;;  %p4521_p7 = scmp.lt.u32.totalorder %s4756_s14, %s5299_s0 }
  0x34   : > { %p4518_p3 = pnand %p4517_p0, %p4516_p13  ;;  %p4522_p9 = scmp.lt.u32.totalorder %s4520_s27, %s4515_s16 }
  0x35   : > { %p4524_p1 = scmp.lt.u32.totalorder %s4515_s16, %s4756_s14 }
  0x36   : > { %p4519_p5 = pneg %p4518_p3  ;;  %p4523_p2 = por %p4522_p9, %p4521_p7 }
  0x38   : > { %p4525_p4 = por %p4524_p1, %p4523_p2 }
  0x3a   : > { %p4526_p6 = pnand %p4525_p4, %p4519_p5 }
  0x3c   : > { %4529 = shalt.err (!%p4526_p6)
}
  0x3d   : > { %s4530_s10 = scalar_lea.vmem %s4762_s7, 4992  ;;  %s4620_s12 = smov [#allocation2]  }
  0x3e   : > { %p4531_p8 = scmp.ne.s32.totalorder %s4762_s7, %s4530_s10  ;;  %s4535_s13 = sshll.u32 %s4620_s12, 4  ;;  %s4536_s13 = int_to_ptr.vmem [resolvable:$false] %s4535_s13 }
  0x3f   : > { %s4537_s6 = scalar_lea.vmem %s4536_s13, 9984  ;;  %p4538_p3 = scmp.lt.s32.totalorder %s4762_s7, %s4536_s13 }
  0x40   : > { %p4533_p10 = pnand %p4531_p8, %p4517_p0  ;;  %p4539_p7 = scmp.lt.s32.totalorder %s4537_s6, %s4530_s10 }
  0x42   : > { %p4534_p13 = pneg %p4533_p10  ;;  %p4540_p9 = por %p4539_p7, %p4538_p3 }
  0x44   : > { %p4541_p2 = pnand %p4540_p9, %p4534_p13 }
  0x46   : > { %4544 = shalt.err (!%p4541_p2)
}
  0x47   : > { %s4621_s16 = smov 384   ;;  %s4622_s17 = smov 24  }
  0x48   : > { %4031 = dma.hbm_to_vmem [thread:$0]  (!%p4758_p11), %s4756_s14, 4992, %s4762_s7, %s4764_s15, %s4621_s16, %s4621_s16, %s4622_s17  }
  0x49   : > { %p5315_p0 = scmp.ne.s32.totalorder %s5310_s26, 0 }
  0x4a   : > { %s4795_s23 = sand.u32 (!%p5315_p0), 1, %s4607_s19   ;;  %p5316_p5 = scmp.ne.s32.totalorder (!%p5315_p0), %s5308_s24, 0 }
  0x4b   : > { %226 = sbr.rel (%p5315_p0) target bundleno = 651 (0x28b), region = 32  ;;  %s229_s11 = scalar_lea.sflag (!%p5315_p0), [#allocation3], %s4795_s23 }
  0x4c   : > { %s4013_s27 = smul.u32 (!%p5315_p0), 312, %s4795_s23 }
  0x4e   : > { %s4799_s29 = scalar_lea.vmem (!%p5315_p0), [#allocation2], %s4013_s27 }
  0x52   : > { %4590 = dma.done.wait (%p5316_p5), %s229_s11, 4992  }
  0x53   : > { %4592 = vsyncadd (%p5316_p5), %s229_s11, 4294962304  ;;  %p5317_p11 = scmp.eq.s32.totalorder %s4677_s22, 0 }
  0x55   : > { %4594 = dma.done.wait (%p5317_p11), [#allocation6], 30720   ;;  %p5318_p1 = pmov %p5317_p11 }
  0x56   : > { %v4079_v0 = vld [vmem:[#allocation5 + $0x4] ss:$20 sps:$4 sm:$0xff]   ;;  %v4081_v1 = vld [vmem:[#allocation5 + $0xc] ss:$20 sps:$4 sm:$0xff]   ;;  %v4084_v3 = vld [vmem:[#allocation5 + $0x8] ss:$20 sps:$4 sm:$0xff]  }
  0x57   : > { %4596 = vsyncadd (%p5318_p1), [#allocation6], 4294936576  ;;  %2056 = vmatprep.subr.bf16.mxu0 %v4079_v0  ;;  %v4083_v2 = vld [vmem:[#allocation5] ss:$20 sps:$4 sm:$0xff]   ;;  %2359 = vmatprep.subr.bf16.mxu1 %v4081_v1  ;;  %v4089_v6 = vld [vmem:[#allocation5 + $0x28] ss:$20 sps:$4 sm:$0xff]  }
  0x58   : > { %v4085_v4 = vld [vmem:[#allocation5 + $0x2c] ss:$20 sps:$4 sm:$0xff]   ;;  %2057 = vmatpush1.bf16.msra.mxu0 %v4083_v2  ;;  %2360 = vmatpush1.bf16.msra.mxu1 %v4084_v3  ;;  %v4087_v5 = vld [vmem:[#allocation5 + $0x34] ss:$20 sps:$4 sm:$0xff]   ;;  %v4090_v7 = vld [vmem:[#allocation5 + $0x30] ss:$20 sps:$4 sm:$0xff]  }
  0x59   : > { %2058 = vmatprep.subr.bf16.mxu0 %v4085_v4  ;;  %2361 = vmatprep.subr.bf16.mxu1 %v4087_v5  ;;  %v4091_v8 = vld [vmem:[#allocation5 + $0x54] ss:$20 sps:$4 sm:$0xff]   ;;  %v4093_v9 = vld [vmem:[#allocation5 + $0x5c] ss:$20 sps:$4 sm:$0xff]   ;;  %v4096_v11 = vld [vmem:[#allocation5 + $0x58] ss:$20 sps:$4 sm:$0xff]  }
  0x5a   : > { %v4095_v10 = vld [vmem:[#allocation5 + $0x50] ss:$20 sps:$4 sm:$0xff]   ;;  %v4101_v14 = vld [vmem:[#allocation5 + $0x78] ss:$20 sps:$4 sm:$0xff]   ;;  %v4102_v15 = vld [vmem:[#allocation5 + $0x80] ss:$20 sps:$4 sm:$0xff]  }
  0x5b   : > { %v4097_v12 = vld [vmem:[#allocation5 + $0x7c] ss:$20 sps:$4 sm:$0xff]   ;;  %v4099_v13 = vld [vmem:[#allocation5 + $0x84] ss:$20 sps:$4 sm:$0xff]   ;;  %v4105_v17 = vld [vmem:[#allocation5 + $0xac] ss:$20 sps:$4 sm:$0xff]  }
  0x5c   : > { %2059 = vmatpush1.bf16.msra.mxu0 %v4089_v6  ;;  %2362 = vmatpush1.bf16.msra.mxu1 %v4090_v7  ;;  %v4103_v16 = vld [vmem:[#allocation5 + $0xa4] ss:$20 sps:$4 sm:$0xff]   ;;  %v4107_v18 = vld [vmem:[#allocation5 + $0xa0] ss:$20 sps:$4 sm:$0xff]   ;;  %v4108_v19 = vld [vmem:[#allocation5 + $0xa8] ss:$20 sps:$4 sm:$0xff]  }
  0x5d   : > { %2060 = vmatprep.subr.bf16.mxu0 %v4091_v8  ;;  %2363 = vmatprep.subr.bf16.mxu1 %v4093_v9  ;;  %v4109_v20 = vld [vmem:[#allocation5 + $0xcc] ss:$20 sps:$4 sm:$0xff]   ;;  %v4111_v21 = vld [vmem:[#allocation5 + $0xd4] ss:$20 sps:$4 sm:$0xff]   ;;  %v4114_v23 = vld [vmem:[#allocation5 + $0xd0] ss:$20 sps:$4 sm:$0xff]  }
  0x5e   : > { %v4113_v22 = vld [vmem:[#allocation5 + $0xc8] ss:$20 sps:$4 sm:$0xff]   ;;  %v4119_v26 = vld [vmem:[#allocation5 + $0xf0] ss:$20 sps:$4 sm:$0xff]   ;;  %v4120_v27 = vld [vmem:[#allocation5 + $0xf8] ss:$20 sps:$4 sm:$0xff]  }
  0x5f   : > { %v4115_v24 = vld [vmem:[#allocation5 + $0xf4] ss:$20 sps:$4 sm:$0xff]   ;;  %v4117_v25 = vld [vmem:[#allocation5 + $0xfc] ss:$20 sps:$4 sm:$0xff]   ;;  %v4123_v29 = vld [vmem:[#allocation5 + $0x124] ss:$20 sps:$4 sm:$0xff]  }
  0x60   : > { %2061 = vmatpush1.bf16.msra.mxu0 %v4095_v10  ;;  %2364 = vmatpush1.bf16.msra.mxu1 %v4096_v11  ;;  %v4121_v28 = vld [vmem:[#allocation5 + $0x11c] ss:$20 sps:$4 sm:$0xff]   ;;  %v4125_v30 = vld [vmem:[#allocation5 + $0x118] ss:$20 sps:$4 sm:$0xff]   ;;  %v4126_v31 = vld [vmem:[#allocation5 + $0x120] ss:$20 sps:$4 sm:$0xff]  }
  0x61   : > { %2062 = vmatprep.subr.bf16.mxu0 %v4097_v12  ;;  %2365 = vmatprep.subr.bf16.mxu1 %v4099_v13  ;;  %v4127_v32 = vld [vmem:[#allocation5 + $0x144] ss:$20 sps:$4 sm:$0xff]   ;;  %v4129_v33 = vld [vmem:[#allocation5 + $0x14c] ss:$20 sps:$4 sm:$0xff]   ;;  %v4132_v35 = vld [vmem:[#allocation5 + $0x148] ss:$20 sps:$4 sm:$0xff]  }
  0x62   : > { %v4131_v34 = vld [vmem:[#allocation5 + $0x140] ss:$20 sps:$4 sm:$0xff]   ;;  %v4137_v38 = vld [vmem:[#allocation5 + $0x168] ss:$20 sps:$4 sm:$0xff]   ;;  %v4138_v39 = vld [vmem:[#allocation5 + $0x170] ss:$20 sps:$4 sm:$0xff]  }
  0x63   : > { %v4133_v36 = vld [vmem:[#allocation5 + $0x16c] ss:$20 sps:$4 sm:$0xff]   ;;  %v4135_v37 = vld [vmem:[#allocation5 + $0x174] ss:$20 sps:$4 sm:$0xff]   ;;  %v4141_v41 = vld [vmem:[#allocation5 + $0x19c] ss:$20 sps:$4 sm:$0xff]  }
  0x64   : > { %2063 = vmatpush1.bf16.msra.mxu0 %v4101_v14  ;;  %2366 = vmatpush1.bf16.msra.mxu1 %v4102_v15  ;;  %v4139_v40 = vld [vmem:[#allocation5 + $0x194] ss:$20 sps:$4 sm:$0xff]   ;;  %v4143_v42 = vld [vmem:[#allocation5 + $0x190] ss:$20 sps:$4 sm:$0xff]   ;;  %v4144_v43 = vld [vmem:[#allocation5 + $0x198] ss:$20 sps:$4 sm:$0xff]  }
  0x65   : > { %2064 = vmatprep.subr.bf16.mxu0 %v4103_v16  ;;  %2367 = vmatprep.subr.bf16.mxu1 %v4105_v17  ;;  %v4145_v44 = vld [vmem:[#allocation5 + $0x1bc] ss:$20 sps:$4 sm:$0xff]   ;;  %v4147_v45 = vld [vmem:[#allocation5 + $0x1c4] ss:$20 sps:$4 sm:$0xff]   ;;  %v4150_v48 = vld [vmem:[#allocation5 + $0x1c0] ss:$20 sps:$4 sm:$0xff]  }
  0x66   : > { %v4149_v46 = vld [vmem:[#allocation5 + $0x1b8] ss:$20 sps:$4 sm:$0xff]   ;;  %v4155_v51 = vld [vmem:[#allocation5 + $0x1e0] ss:$20 sps:$4 sm:$0xff]   ;;  %v4156_v52 = vld [vmem:[#allocation5 + $0x1e8] ss:$20 sps:$4 sm:$0xff]  }
  0x67   : > { %v4175_v47 = vld [vmem:[%s4799_s29 + $0x4] ss:$24 sps:$4 sm:$0xff]   ;;  %v4161_v55 = vld [vmem:[#allocation5 + $0x208] ss:$20 sps:$4 sm:$0xff]   ;;  %v4204_v15 = vld [vmem:[%s4799_s29 + $0x30] ss:$24 sps:$4 sm:$0xff]  }
  0x68   : > { %2065 = vmatpush1.bf16.msra.mxu0 %v4107_v18  ;;  %2368 = vmatpush1.bf16.msra.mxu1 %v4108_v19  ;;  %v4151_v49 = vld [vmem:[#allocation5 + $0x1e4] ss:$20 sps:$4 sm:$0xff]   ;;  %v4153_v50 = vld [vmem:[#allocation5 + $0x1ec] ss:$20 sps:$4 sm:$0xff]   ;;  %v4159_v54 = vld [vmem:[#allocation5 + $0x214] ss:$20 sps:$4 sm:$0xff]  }
  0x69   : > { %2066 = vmatprep.subr.bf16.mxu0 %v4109_v20  ;;  %2369 = vmatprep.subr.bf16.mxu1 %v4111_v21  ;;  %v4157_v53 = vld [vmem:[#allocation5 + $0x20c] ss:$20 sps:$4 sm:$0xff]   ;;  %v4162_v56 = vld [vmem:[#allocation5 + $0x210] ss:$20 sps:$4 sm:$0xff]   ;;  %v4163_v57 = vld [vmem:[#allocation5 + $0x234] ss:$20 sps:$4 sm:$0xff]  }
  0x6a   : > { %2088 = vmatprep.mubr.bf16.mxu0 %v4175_v47  ;;  %2391 = vmatprep.mubr.bf16.mxu1 %v4175_v47  ;;  %v4165_v58 = vld [vmem:[#allocation5 + $0x23c] ss:$20 sps:$4 sm:$0xff]   ;;  %v4168_v60 = vld [vmem:[#allocation5 + $0x238] ss:$20 sps:$4 sm:$0xff]   ;;  %v4174_v0 = vld [vmem:[#allocation5 + $0x260] ss:$20 sps:$4 sm:$0xff]  }
  0x6b   : > { %v4167_v59 = vld [vmem:[#allocation5 + $0x230] ss:$20 sps:$4 sm:$0xff]   ;;  %v4173_v63 = vld [vmem:[#allocation5 + $0x258] ss:$20 sps:$4 sm:$0xff]   ;;  %v4177_v3 = vld [vmem:[#allocation5 + $0x280] ss:$20 sps:$4 sm:$0xff]  }
  0x6c   : > { %2067 = vmatpush1.bf16.msra.mxu0 %v4113_v22  ;;  %2370 = vmatpush1.bf16.msra.mxu1 %v4114_v23  ;;  %v4169_v61 = vld [vmem:[#allocation5 + $0x25c] ss:$20 sps:$4 sm:$0xff]   ;;  %v4171_v62 = vld [vmem:[#allocation5 + $0x264] ss:$20 sps:$4 sm:$0xff]   ;;  %v4182_v2 = vld [vmem:[#allocation5 + $0x28c] ss:$20 sps:$4 sm:$0xff]  }
  0x6d   : > { %2068 = vmatprep.subr.bf16.mxu0 %v4115_v24  ;;  %2371 = vmatprep.subr.bf16.mxu1 %v4117_v25  ;;  %v4179_v1 = vld [vmem:[#allocation5 + $0x284] ss:$20 sps:$4 sm:$0xff]   ;;  %v4180_v4 = vld [vmem:[#allocation5 + $0x288] ss:$20 sps:$4 sm:$0xff]   ;;  %v4186_v6 = vld [vmem:[#allocation5 + $0x2ac] ss:$20 sps:$4 sm:$0xff]  }
  0x6e   : > { %v4183_v5 = vld [vmem:[%s4799_s29] ss:$24 sps:$4 sm:$0xff]   ;;  %v4202_v8 = vld [vmem:[%s4799_s29 + $0x34] ss:$24 sps:$4 sm:$0xff]   ;;  %v4193_v14 = vld [vmem:[#allocation5 + $0x2d8] ss:$20 sps:$4 sm:$0xff]  }
  0x6f   : > { %v4189_v7 = vld [vmem:[#allocation5 + $0x2b4] ss:$20 sps:$4 sm:$0xff]   ;;  %v4187_v10 = vld [vmem:[#allocation5 + $0x2b0] ss:$20 sps:$4 sm:$0xff]   ;;  %v4196_v19 = vld [vmem:[#allocation5 + $0x2f8] ss:$20 sps:$4 sm:$0xff]  }
  0x70   : > { %2069 = vmatpush1.bf16.msra.mxu0 %v4119_v26  ;;  %2372 = vmatpush1.bf16.msra.mxu1 %v4120_v27  ;;  %v4184_v9 = vld [vmem:[#allocation5 + $0x2a8] ss:$20 sps:$4 sm:$0xff]   ;;  %v4190_v13 = vld [vmem:[#allocation5 + $0x2d0] ss:$20 sps:$4 sm:$0xff]   ;;  %v4199_v20 = vld [vmem:[#allocation5 + $0x300] ss:$20 sps:$4 sm:$0xff]  }
  0x71   : > { %2070 = vmatprep.subr.bf16.mxu0 %v4121_v28  ;;  %2373 = vmatprep.subr.bf16.mxu1 %v4123_v29  ;;  %v4192_v11 = vld [vmem:[#allocation5 + $0x2d4] ss:$20 sps:$4 sm:$0xff]   ;;  %v4195_v12 = vld [vmem:[#allocation5 + $0x2dc] ss:$20 sps:$4 sm:$0xff]   ;;  %v4201_v17 = vld [vmem:[#allocation5 + $0x304] ss:$20 sps:$4 sm:$0xff]  }
  0x72   : > { %v4198_v16 = vld [vmem:[#allocation5 + $0x2fc] ss:$20 sps:$4 sm:$0xff]   ;;  %v4217_v18 = vld [vmem:[%s4799_s29 + $0x64] ss:$24 sps:$4 sm:$0xff]   ;;  %vm2970_vm0 = vcmask 1046528   ;;  %vm3148_vm1 = vcmask 1047556  }
  0x73   : > { %v4207_v21 = vld [vmem:[#allocation5 + $0x324] ss:$20 sps:$4 sm:$0xff]   ;;  %v4210_v22 = vld [vmem:[#allocation5 + $0x32c] ss:$20 sps:$4 sm:$0xff]   ;;  %v4208_v24 = vld [vmem:[#allocation5 + $0x328] ss:$20 sps:$4 sm:$0xff]  }
  0x74   : > { %2071 = vmatpush1.bf16.msra.mxu0 %v4125_v30  ;;  %2374 = vmatpush1.bf16.msra.mxu1 %v4126_v31  ;;  %v4205_v23 = vld [vmem:[#allocation5 + $0x320] ss:$20 sps:$4 sm:$0xff]   ;;  %v4211_v29 = vld [vmem:[#allocation5 + $0x348] ss:$20 sps:$4 sm:$0xff]   ;;  %v4214_v30 = vld [vmem:[#allocation5 + $0x350] ss:$20 sps:$4 sm:$0xff]  }
  0x75   : > { %2072 = vmatprep.subr.bf16.mxu0 %v4127_v32  ;;  %2375 = vmatprep.subr.bf16.mxu1 %v4129_v33  ;;  %v4219_v25 = vld [vmem:[%s4799_s29 + $0x60] ss:$24 sps:$4 sm:$0xff]   ;;  %v4232_v28 = vld [vmem:[%s4799_s29 + $0x94] ss:$24 sps:$4 sm:$0xff]   ;;  %vm3158_vm2 = vcmask 1042432   ;;  %p271_p4 = scmp.lt.s32.totalorder %s4677_s22, 1 }
  0x76   : > { %v4213_v26 = vld [vmem:[#allocation5 + $0x34c] ss:$20 sps:$4 sm:$0xff]   ;;  %v4216_v27 = vld [vmem:[#allocation5 + $0x354] ss:$20 sps:$4 sm:$0xff]   ;;  %v4225_v32 = vld [vmem:[#allocation5 + $0x37c] ss:$20 sps:$4 sm:$0xff]  }
  0x77   : > { %v4222_v31 = vld [vmem:[#allocation5 + $0x374] ss:$20 sps:$4 sm:$0xff]   ;;  %v4220_v33 = vld [vmem:[#allocation5 + $0x370] ss:$20 sps:$4 sm:$0xff]   ;;  %s5178_s7 = scalar_select %p271_p4, %s4677_s22, 1  ;;  %vm3203_vm3 = vcmask 1040384  }
  0x78   : > { %2073 = vmatpush1.bf16.msra.mxu0 %v4131_v34  ;;  %2376 = vmatpush1.bf16.msra.mxu1 %v4132_v35  ;;  %v4234_v34 = vld [vmem:[%s4799_s29 + $0x90] ss:$24 sps:$4 sm:$0xff]   ;;  %v4246_v47 = vld [vmem:[#allocation5 + $0x3f4] ss:$20 sps:$4 sm:$0xff]   ;;  %vm3205_vm4 = vcmask 1041408   ;;  %s4014_s10 = smul.u32 104, %s4795_s23 }
  0x79   : > { %2074 = vmatprep.subr.bf16.mxu0 %v4133_v36  ;;  %2377 = vmatprep.subr.bf16.mxu1 %v4135_v37  ;;  %v4223_v35 = vld [vmem:[#allocation5 + $0x378] ss:$20 sps:$4 sm:$0xff]   ;;  %v4228_v36 = vld [vmem:[#allocation5 + $0x39c] ss:$20 sps:$4 sm:$0xff]   ;;  %s3435_s15 = sshll.u32 %s5178_s7, 3  ;;  %vm3208_vm5 = vcmask 1043456  }
  0x7a   : > { %v4231_v37 = vld [vmem:[#allocation5 + $0x3a4] ss:$20 sps:$4 sm:$0xff]   ;;  %s274_s17 = scalar_lea.vmem %s5302_s3, %s3435_s15  ;;  %s5210_s24 = scalar_lea.vmem [#allocation7], %s4014_s10 }
  0x7b   : > { %s4015_s26 = smul.u32 1664, %s4677_s22  ;;  %s3297_s14 = sshll.u32 %s5210_s24, 4  ;;  %s5254_s14 = int_to_ptr.vmem [resolvable:$true] %s3297_s14 }
  0x7c   : > { %2075 = vmatpush1.bf16.msra.mxu0 %v4137_v38  ;;  %2378 = vmatpush1.bf16.msra.mxu1 %v4138_v39  ;;  %v4247_v38 = vld [vmem:[%s4799_s29 + $0xc4] ss:$24 sps:$4 sm:$0xff]   ;;  %s3278_s10 = scalar_lea.sflag [#allocation4], %s4795_s23  ;;  %s4545_s22 = scalar_lea.vmem %s5254_s14, 1664 }
  0x7d   : > { %2076 = vmatprep.subr.bf16.mxu0 %v4139_v40  ;;  %2379 = vmatprep.subr.bf16.mxu1 %v4141_v41  ;;  %v4226_v39 = vld [vmem:[#allocation5 + $0x398] ss:$20 sps:$4 sm:$0xff]   ;;  %v4229_v40 = vld [vmem:[#allocation5 + $0x3a0] ss:$20 sps:$4 sm:$0xff]   ;;  %p4546_p6 = scmp.ne.s32.totalorder %s5254_s14, %s4545_s22  ;;  %s4623_s12 = smov [#allocation7]  }
  0x7e   : > { %v4237_v41 = vld [vmem:[#allocation5 + $0x3c4] ss:$20 sps:$4 sm:$0xff]   ;;  %s4549_s13 = sshll.u32 %s4623_s12, 4  ;;  %s4550_s13 = int_to_ptr.vmem [resolvable:$false] %s4549_s13 }
  0x7f   : > { %p4547_p8 = pnand %p4546_p6, %p4747_p12  ;;  %s4551_s6 = scalar_lea.vmem %s4550_s13, 3328 }
  0x80   : > { %2077 = vmatpush1.bf16.msra.mxu0 %v4143_v42  ;;  %2380 = vmatpush1.bf16.msra.mxu1 %v4144_v43  ;;  %v4240_v42 = vld [vmem:[#allocation5 + $0x3cc] ss:$20 sps:$4 sm:$0xff]   ;;  %p4552_p13 = scmp.lt.s32.totalorder %s5254_s14, %s4550_s13  ;;  %p4553_p3 = scmp.lt.s32.totalorder %s4551_s6, %s4545_s22 }
  0x81   : > { %2078 = vmatprep.subr.bf16.mxu0 %v4145_v44  ;;  %2381 = vmatprep.subr.bf16.mxu1 %v4147_v45  ;;  %v4235_v43 = vld [vmem:[#allocation5 + $0x3c0] ss:$20 sps:$4 sm:$0xff]   ;;  %v4238_v45 = vld [vmem:[#allocation5 + $0x3c8] ss:$20 sps:$4 sm:$0xff]   ;;  %p4548_p10 = pneg %p4547_p8 }
  0x82   : > { %v4249_v44 = vld [vmem:[%s4799_s29 + $0xc0] ss:$24 sps:$4 sm:$0xff]   ;;  %p4554_p7 = por %p4553_p3, %p4552_p13 }
  0x84   : > { %2079 = vmatpush1.bf16.msra.mxu0 %v4149_v46  ;;  %2382 = vmatpush1.bf16.msra.mxu1 %v4150_v48  ;;  %v4243_v46 = vld [vmem:[#allocation5 + $0x3ec] ss:$20 sps:$4 sm:$0xff]   ;;  %v4262_v48 = vld [vmem:[%s4799_s29 + $0xf4] ss:$24 sps:$4 sm:$0xff]   ;;  %p4555_p9 = pnand %p4554_p7, %p4548_p10 }
  0x85   : > { %2080 = vmatprep.subr.bf16.mxu0 %v4151_v49  ;;  %2383 = vmatprep.subr.bf16.mxu1 %v4153_v50  ;;  %v4241_v49 = vld [vmem:[#allocation5 + $0x3e8] ss:$20 sps:$4 sm:$0xff]   ;;  %v4244_v50 = vld [vmem:[#allocation5 + $0x3f0] ss:$20 sps:$4 sm:$0xff]  }
  0x88   : > { %2081 = vmatpush1.bf16.msra.mxu0 %v4155_v51  ;;  %2384 = vmatpush1.bf16.msra.mxu1 %v4156_v52  ;;  %v4252_v51 = vld [vmem:[#allocation5 + $0x414] ss:$20 sps:$4 sm:$0xff]   ;;  %v4255_v52 = vld [vmem:[#allocation5 + $0x41c] ss:$20 sps:$4 sm:$0xff]  }
  0x89   : > { %2082 = vmatprep.subr.bf16.mxu0 %v4157_v53  ;;  %2385 = vmatprep.subr.bf16.mxu1 %v4159_v54  ;;  %v4250_v53 = vld [vmem:[#allocation5 + $0x410] ss:$20 sps:$4 sm:$0xff]  }
  0x8a   : > { %v4264_v54 = vld [vmem:[%s4799_s29 + $0xf0] ss:$24 sps:$4 sm:$0xff]  }
  0x8c   : > { %2083 = vmatpush1.bf16.msra.mxu0 %v4161_v55  ;;  %2386 = vmatpush1.bf16.msra.mxu1 %v4162_v56  ;;  %v316_v55 = vld [vmem:[%s4799_s29 + $0x120] sm:$0xff] }
  0x8d   : > { %2084 = vmatprep.subr.bf16.mxu0 %v4163_v57  ;;  %2387 = vmatprep.subr.bf16.mxu1 %v4165_v58  ;;  %v4253_v56 = vld [vmem:[#allocation5 + $0x418] ss:$20 sps:$4 sm:$0xff]   ;;  %v4258_v57 = vld [vmem:[#allocation5 + $0x43c] ss:$20 sps:$4 sm:$0xff]  }
  0x8e   : > { %v4261_v58 = vld [vmem:[#allocation5 + $0x444] ss:$20 sps:$4 sm:$0xff]  }
  0x90   : > { %2085 = vmatpush1.bf16.msra.mxu0 %v4167_v59  ;;  %2388 = vmatpush1.bf16.msra.mxu1 %v4168_v60  ;;  %v4822_v59 = vcombine.high %v316_v55, %v316_v55  ;;  %v4256_v60 = vld [vmem:[#allocation5 + $0x438] ss:$20 sps:$4 sm:$0xff]  }
  0x91   : > { %2086 = vmatprep.subr.bf16.mxu0 %v4169_v61  ;;  %2389 = vmatprep.subr.bf16.mxu1 %v4171_v62  ;;  %v4259_v61 = vld [vmem:[#allocation5 + $0x440] ss:$20 sps:$4 sm:$0xff]   ;;  %v4267_v62 = vld [vmem:[#allocation5 + $0x464] ss:$20 sps:$4 sm:$0xff]  }
  0x94   : > { %2087 = vmatpush1.bf16.msra.mxu0 %v4173_v63  ;;  %2390 = vmatpush1.bf16.msra.mxu1 %v4174_v0  ;;  %v4270_v63 = vld [vmem:[#allocation5 + $0x46c] ss:$20 sps:$4 sm:$0xff]  }
  0x95   : > { %2157 = vmatprep.subr.bf16.mxu0 %v4179_v1  ;;  %2460 = vmatprep.subr.bf16.mxu1 %v4182_v2  ;;  %v4265_v0 = vld [vmem:[#allocation5 + $0x460] ss:$20 sps:$4 sm:$0xff]   ;;  %v4826_v1 = vcombine.low %v316_v55, %v316_v55  ;;  %v4268_v2 = vld [vmem:[#allocation5 + $0x468] ss:$20 sps:$4 sm:$0xff]  }
  0x96   : > { %v4348_v55 = vld [vmem:[#allocation5 + $0x620] ss:$20 sps:$4 sm:$0xff]  }
  0x97   : > { %2089 = vmatmul.mubr.bf16.vlgmr.msra.gmra.mrb[0].mxu0 %v4183_v5  ;;  %2392 = vmatmul.mubr.bf16.vlgmr.msra.gmra.mrb[0].mxu1 %v4183_v5  ;;  %v4829_v5 = vld [vmem:[%s4799_s29 + $0xc] ss:$24 sps:$4 sm:$0xff]  }
  0x98   : > { %2158 = vmatpush1.bf16.msra.mxu0 %v4177_v3  ;;  %2461 = vmatpush1.bf16.msra.mxu1 %v4180_v4  ;;  %v4273_v3 = vld [vmem:[#allocation5 + $0x48c] ss:$20 sps:$4 sm:$0xff]   ;;  %v4276_v4 = vld [vmem:[#allocation5 + $0x494] ss:$20 sps:$4 sm:$0xff]  }
  0x99   : > { %2159 = vmatprep.subr.bf16.mxu0 %v4186_v6  ;;  %2462 = vmatprep.subr.bf16.mxu1 %v4189_v7  ;;  %v4271_v6 = vld [vmem:[#allocation5 + $0x488] ss:$20 sps:$4 sm:$0xff]   ;;  %v4274_v7 = vld [vmem:[#allocation5 + $0x490] ss:$20 sps:$4 sm:$0xff]  }
  0x9a   : > { %2401 = vmatprep.mubr.bf16.mxu1 %v4202_v8  ;;  %2098 = vmatprep.mubr.bf16.mxu0 %v4202_v8  ;;  %v4281_v8 = vld [vmem:[#allocation5 + $0x4b4] ss:$20 sps:$4 sm:$0xff]  }
  0x9c   : > { %2160 = vmatpush1.bf16.msra.mxu0 %v4184_v9  ;;  %2463 = vmatpush1.bf16.msra.mxu1 %v4187_v10  ;;  %v4284_v9 = vld [vmem:[#allocation5 + $0x4bc] ss:$20 sps:$4 sm:$0xff]  }
  0x9d   : > { %2161 = vmatprep.subr.bf16.mxu0 %v4192_v11  ;;  %2464 = vmatprep.subr.bf16.mxu1 %v4195_v12  ;;  %v4279_v10 = vld [vmem:[#allocation5 + $0x4b0] ss:$20 sps:$4 sm:$0xff]   ;;  %v4282_v11 = vld [vmem:[#allocation5 + $0x4b8] ss:$20 sps:$4 sm:$0xff]  }
  0x9e   : > { %v4287_v12 = vld [vmem:[#allocation5 + $0x4dc] ss:$20 sps:$4 sm:$0xff]  }
  0x9f   : > { %2402 = vmatmul.mubr.bf16.gmra.mrb[4].mxu1 %v4204_v15  ;;  %2099 = vmatmul.mubr.bf16.gmra.mrb[4].mxu0 %v4204_v15  ;;  %v4288_v15 = vld [vmem:[#allocation5 + $0x4e0] ss:$20 sps:$4 sm:$0xff]  }
  0xa0   : > { %2162 = vmatpush1.bf16.msra.mxu0 %v4190_v13  ;;  %2465 = vmatpush1.bf16.msra.mxu1 %v4193_v14  ;;  %v4290_v13 = vld [vmem:[#allocation5 + $0x4e4] ss:$20 sps:$4 sm:$0xff]  }
  0xa1   : > { %2163 = vmatprep.subr.bf16.mxu0 %v4198_v16  ;;  %2466 = vmatprep.subr.bf16.mxu1 %v4201_v17  ;;  %v4285_v14 = vld [vmem:[#allocation5 + $0x4d8] ss:$20 sps:$4 sm:$0xff]  }
  0xa2   : > { %2411 = vmatprep.mubr.bf16.mxu1 %v4217_v18  ;;  %2108 = vmatprep.mubr.bf16.mxu0 %v4217_v18  ;;  %v4296_v16 = vld [vmem:[#allocation5 + $0x504] ss:$20 sps:$4 sm:$0xff]   ;;  %v4299_v17 = vld [vmem:[#allocation5 + $0x50c] ss:$20 sps:$4 sm:$0xff]  }
  0xa3   : > { %v4836_v18 = vld [vmem:[%s4799_s29 + $0x8] ss:$24 sps:$4 sm:$0xff]  }
  0xa4   : > { %2164 = vmatpush1.bf16.msra.mxu0 %v4196_v19  ;;  %2467 = vmatpush1.bf16.msra.mxu1 %v4199_v20  ;;  %v4294_v19 = vld [vmem:[#allocation5 + $0x500] ss:$20 sps:$4 sm:$0xff]   ;;  %v4297_v20 = vld [vmem:[#allocation5 + $0x508] ss:$20 sps:$4 sm:$0xff]  }
  0xa5   : > { %2165 = vmatprep.subr.bf16.mxu0 %v4207_v21  ;;  %2468 = vmatprep.subr.bf16.mxu1 %v4210_v22  ;;  %v4302_v21 = vld [vmem:[#allocation5 + $0x52c] ss:$20 sps:$4 sm:$0xff]   ;;  %v4305_v22 = vld [vmem:[#allocation5 + $0x534] ss:$20 sps:$4 sm:$0xff]  }
  0xa7   : > { %2412 = vmatmul.mubr.bf16.gmra.mrb[8].mxu1 %v4219_v25  ;;  %2109 = vmatmul.mubr.bf16.gmra.mrb[8].mxu0 %v4219_v25  ;;  %v4303_v25 = vld [vmem:[#allocation5 + $0x530] ss:$20 sps:$4 sm:$0xff]  }
  0xa8   : > { %2166 = vmatpush1.bf16.msra.mxu0 %v4205_v23  ;;  %2469 = vmatpush1.bf16.msra.mxu1 %v4208_v24  ;;  %v4839_v23 = vld [vmem:[%s4799_s29 + $0x3c] ss:$24 sps:$4 sm:$0xff]  }
  0xa9   : > { %2167 = vmatprep.subr.bf16.mxu0 %v4213_v26  ;;  %2470 = vmatprep.subr.bf16.mxu1 %v4216_v27  ;;  %v4300_v24 = vld [vmem:[#allocation5 + $0x528] ss:$20 sps:$4 sm:$0xff]  }
  0xaa   : > { %2421 = vmatprep.mubr.bf16.mxu1 %v4232_v28  ;;  %2118 = vmatprep.mubr.bf16.mxu0 %v4232_v28  ;;  %v4311_v26 = vld [vmem:[#allocation5 + $0x554] ss:$20 sps:$4 sm:$0xff]   ;;  %v4314_v27 = vld [vmem:[#allocation5 + $0x55c] ss:$20 sps:$4 sm:$0xff]  }
  0xab   : > { %v4846_v28 = vld [vmem:[%s4799_s29 + $0x38] ss:$24 sps:$4 sm:$0xff]  }
  0xac   : > { %2168 = vmatpush1.bf16.msra.mxu0 %v4211_v29  ;;  %2471 = vmatpush1.bf16.msra.mxu1 %v4214_v30  ;;  %v4309_v29 = vld [vmem:[#allocation5 + $0x550] ss:$20 sps:$4 sm:$0xff]   ;;  %v4312_v30 = vld [vmem:[#allocation5 + $0x558] ss:$20 sps:$4 sm:$0xff]  }
  0xad   : > { %2169 = vmatprep.subr.bf16.mxu0 %v4222_v31  ;;  %2472 = vmatprep.subr.bf16.mxu1 %v4225_v32  ;;  %v4317_v31 = vld [vmem:[#allocation5 + $0x57c] ss:$20 sps:$4 sm:$0xff]   ;;  %v4320_v32 = vld [vmem:[#allocation5 + $0x584] ss:$20 sps:$4 sm:$0xff]  }
  0xaf   : > { %2422 = vmatmul.mubr.bf16.gmra.mrb[12].mxu1 %v4234_v34  ;;  %2119 = vmatmul.mubr.bf16.gmra.mrb[12].mxu0 %v4234_v34  ;;  %v4315_v34 = vld [vmem:[#allocation5 + $0x578] ss:$20 sps:$4 sm:$0xff]  }
  0xb0   : > { %2170 = vmatpush1.bf16.msra.mxu0 %v4220_v33  ;;  %2473 = vmatpush1.bf16.msra.mxu1 %v4223_v35  ;;  %v4849_v33 = vld [vmem:[%s4799_s29 + $0x6c] ss:$24 sps:$4 sm:$0xff]  }
  0xb1   : > { %2171 = vmatprep.subr.bf16.mxu0 %v4228_v36  ;;  %2474 = vmatprep.subr.bf16.mxu1 %v4231_v37  ;;  %v4318_v35 = vld [vmem:[#allocation5 + $0x580] ss:$20 sps:$4 sm:$0xff]   ;;  %v4326_v36 = vld [vmem:[#allocation5 + $0x5a4] ss:$20 sps:$4 sm:$0xff]  }
  0xb2   : > { %2431 = vmatprep.mubr.bf16.mxu1 %v4247_v38  ;;  %2128 = vmatprep.mubr.bf16.mxu0 %v4247_v38  ;;  %v4329_v37 = vld [vmem:[#allocation5 + $0x5ac] ss:$20 sps:$4 sm:$0xff]   ;;  %v4856_v38 = vld [vmem:[%s4799_s29 + $0x68] ss:$24 sps:$4 sm:$0xff]  }
  0xb4   : > { %2172 = vmatpush1.bf16.msra.mxu0 %v4226_v39  ;;  %2475 = vmatpush1.bf16.msra.mxu1 %v4229_v40  ;;  %v4324_v39 = vld [vmem:[#allocation5 + $0x5a0] ss:$20 sps:$4 sm:$0xff]   ;;  %v4327_v40 = vld [vmem:[#allocation5 + $0x5a8] ss:$20 sps:$4 sm:$0xff]  }
  0xb5   : > { %2173 = vmatprep.subr.bf16.mxu0 %v4237_v41  ;;  %2476 = vmatprep.subr.bf16.mxu1 %v4240_v42  ;;  %v4332_v41 = vld [vmem:[#allocation5 + $0x5cc] ss:$20 sps:$4 sm:$0xff]   ;;  %v4335_v42 = vld [vmem:[#allocation5 + $0x5d4] ss:$20 sps:$4 sm:$0xff]  }
  0xb7   : > { %2432 = vmatmul.mubr.bf16.gmra.mrb[16].mxu1 %v4249_v44  ;;  %2129 = vmatmul.mubr.bf16.gmra.mrb[16].mxu0 %v4249_v44  ;;  %v4859_v44 = vld [vmem:[%s4799_s29 + $0x9c] ss:$24 sps:$4 sm:$0xff]  }
  0xb8   : > { %2174 = vmatpush1.bf16.msra.mxu0 %v4235_v43  ;;  %2477 = vmatpush1.bf16.msra.mxu1 %v4238_v45  ;;  %v4330_v43 = vld [vmem:[#allocation5 + $0x5c8] ss:$20 sps:$4 sm:$0xff]   ;;  %v4333_v45 = vld [vmem:[#allocation5 + $0x5d0] ss:$20 sps:$4 sm:$0xff]  }
  0xb9   : > { %2175 = vmatprep.subr.bf16.mxu0 %v4243_v46  ;;  %2478 = vmatprep.subr.bf16.mxu1 %v4246_v47  ;;  %v4341_v46 = vld [vmem:[#allocation5 + $0x5f4] ss:$20 sps:$4 sm:$0xff]  }
  0xba   : > { %2441 = vmatprep.mubr.bf16.mxu1 %v4262_v48  ;;  %2138 = vmatprep.mubr.bf16.mxu0 %v4262_v48  ;;  %v4864_v47 = vld [vmem:[%s4799_s29 + $0x98] ss:$24 sps:$4 sm:$0xff]   ;;  %v4344_v48 = vld [vmem:[#allocation5 + $0x5fc] ss:$20 sps:$4 sm:$0xff]  }
  0xbc   : > { %2176 = vmatpush1.bf16.msra.mxu0 %v4241_v49  ;;  %2479 = vmatpush1.bf16.msra.mxu1 %v4244_v50  ;;  %v4339_v49 = vld [vmem:[#allocation5 + $0x5f0] ss:$20 sps:$4 sm:$0xff]   ;;  %v4342_v50 = vld [vmem:[#allocation5 + $0x5f8] ss:$20 sps:$4 sm:$0xff]  }
  0xbd   : > { %2177 = vmatprep.subr.bf16.mxu0 %v4252_v51  ;;  %2480 = vmatprep.subr.bf16.mxu1 %v4255_v52  ;;  %v4347_v51 = vld [vmem:[#allocation5 + $0x61c] ss:$20 sps:$4 sm:$0xff]   ;;  %v4350_v52 = vld [vmem:[#allocation5 + $0x624] ss:$20 sps:$4 sm:$0xff]  }
  0xbf   : > { %2442 = vmatmul.mubr.bf16.gmra.mrb[20].mxu1 %v4264_v54  ;;  %2139 = vmatmul.mubr.bf16.gmra.mrb[20].mxu0 %v4264_v54  ;;  %v4345_v54 = vld [vmem:[#allocation5 + $0x618] ss:$20 sps:$4 sm:$0xff]  }
  0xc0   : > { %2178 = vmatpush1.bf16.msra.mxu0 %v4250_v53  ;;  %2481 = vmatpush1.bf16.msra.mxu1 %v4253_v56  ;;  %v4869_v53 = vld [vmem:[%s4799_s29 + $0xcc] ss:$24 sps:$4 sm:$0xff]   ;;  %v4874_v56 = vld [vmem:[%s4799_s29 + $0xc8] ss:$24 sps:$4 sm:$0xff]  }
  0xc1   : > { %2179 = vmatprep.subr.bf16.mxu0 %v4258_v57  ;;  %2482 = vmatprep.subr.bf16.mxu1 %v4261_v58  ;;  %v4356_v57 = vld [vmem:[#allocation5 + $0x644] ss:$20 sps:$4 sm:$0xff]   ;;  %v4359_v58 = vld [vmem:[#allocation5 + $0x64c] ss:$20 sps:$4 sm:$0xff]  }
  0xc2   : > { %2451 = vmatprep.mubr.bf16.mxu1 %v4822_v59  ;;  %2148 = vmatprep.mubr.bf16.mxu0 %v4822_v59 }
  0xc4   : > { %2180 = vmatpush1.bf16.msra.mxu0 %v4256_v60  ;;  %2483 = vmatpush1.bf16.msra.mxu1 %v4259_v61  ;;  %v4354_v60 = vld [vmem:[#allocation5 + $0x640] ss:$20 sps:$4 sm:$0xff]   ;;  %v4357_v61 = vld [vmem:[#allocation5 + $0x648] ss:$20 sps:$4 sm:$0xff]  }
  0xc5   : > { %2181 = vmatprep.subr.bf16.mxu0 %v4267_v62  ;;  %2484 = vmatprep.subr.bf16.mxu1 %v4270_v63  ;;  %v4362_v62 = vld [vmem:[#allocation5 + $0x66c] ss:$20 sps:$4 sm:$0xff]   ;;  %v4365_v63 = vld [vmem:[#allocation5 + $0x674] ss:$20 sps:$4 sm:$0xff]  }
  0xc7   : > { %2452 = vmatmul.mubr.bf16.gmra.mrb[24].mxu1 %v4826_v1  ;;  %2149 = vmatmul.mubr.bf16.gmra.mrb[24].mxu0 %v4826_v1 }
  0xc8   : > { %2182 = vmatpush1.bf16.msra.mxu0 %v4265_v0  ;;  %2485 = vmatpush1.bf16.msra.mxu1 %v4268_v2  ;;  %v4879_v0 = vld [vmem:[%s4799_s29 + $0xfc] ss:$24 sps:$4 sm:$0xff]  }
  0xc9   : > { %2183 = vmatprep.subr.bf16.mxu0 %v4273_v3  ;;  %2486 = vmatprep.subr.bf16.mxu1 %v4276_v4  ;;  %v4360_v2 = vld [vmem:[#allocation5 + $0x668] ss:$20 sps:$4 sm:$0xff]   ;;  %v4363_v3 = vld [vmem:[#allocation5 + $0x670] ss:$20 sps:$4 sm:$0xff]  }
  0xca   : > { %2189 = vmatprep.mubr.bf16.mxu0 %v4829_v5  ;;  %2492 = vmatprep.mubr.bf16.mxu1 %v4829_v5  ;;  %v4371_v4 = vld [vmem:[#allocation5 + $0x694] ss:$20 sps:$4 sm:$0xff]  }
  0xcc   : > { %2184 = vmatpush1.bf16.msra.mxu0 %v4271_v6  ;;  %2487 = vmatpush1.bf16.msra.mxu1 %v4274_v7  ;;  %v4884_v6 = vld [vmem:[%s4799_s29 + $0xf8] ss:$24 sps:$4 sm:$0xff]   ;;  %v4374_v7 = vld [vmem:[#allocation5 + $0x69c] ss:$20 sps:$4 sm:$0xff]  }
  0xcd   : > { %2185 = vmatprep.subr.bf16.mxu0 %v4281_v8  ;;  %2488 = vmatprep.subr.bf16.mxu1 %v4284_v9  ;;  %v4369_v8 = vld [vmem:[#allocation5 + $0x690] ss:$20 sps:$4 sm:$0xff]   ;;  %v4372_v9 = vld [vmem:[#allocation5 + $0x698] ss:$20 sps:$4 sm:$0xff]  }
  0xd0   : > { %2186 = vmatpush1.bf16.msra.mxu0 %v4279_v10  ;;  %2489 = vmatpush1.bf16.msra.mxu1 %v4282_v11  ;;  %v317_v10 = vld [vmem:[%s4799_s29 + $0x128] sm:$0xff] }
  0xd1   : > { %2187 = vmatprep.subr.bf16.mxu0 %v4287_v12  ;;  %2490 = vmatprep.subr.bf16.mxu1 %v4290_v13  ;;  %v4377_v11 = vld [vmem:[#allocation5 + $0x6bc] ss:$20 sps:$4 sm:$0xff]   ;;  %v4380_v12 = vld [vmem:[#allocation5 + $0x6c4] ss:$20 sps:$4 sm:$0xff]  }
  0xd2   : > { %v4375_v13 = vld [vmem:[#allocation5 + $0x6b8] ss:$20 sps:$4 sm:$0xff]  }
  0xd4   : > { %2188 = vmatpush1.bf16.msra.mxu0 %v4285_v14  ;;  %2491 = vmatpush1.bf16.msra.mxu1 %v4288_v15  ;;  %v4889_v14 = vcombine.high %v317_v10, %v317_v10  ;;  %v4378_v15 = vld [vmem:[#allocation5 + $0x6c0] ss:$20 sps:$4 sm:$0xff]  }
  0xd5   : > { %2258 = vmatprep.subr.bf16.mxu0 %v4296_v16  ;;  %2561 = vmatprep.subr.bf16.mxu1 %v4299_v17  ;;  %v4385_v16 = vld [vmem:[#allocation5 + $0x6e4] ss:$20 sps:$4 sm:$0xff]   ;;  %v4388_v17 = vld [vmem:[#allocation5 + $0x6ec] ss:$20 sps:$4 sm:$0xff]  }
  0xd7   : > { %2190 = vmatmul.mubr.bf16.vlgmr.msra.gmra.mrb[0].mxu0 %v4836_v18  ;;  %2493 = vmatmul.mubr.bf16.vlgmr.msra.gmra.mrb[0].mxu1 %v4836_v18 }
  0xd8   : > { %2259 = vmatpush1.bf16.msra.mxu0 %v4294_v19  ;;  %2562 = vmatpush1.bf16.msra.mxu1 %v4297_v20  ;;  %v4383_v19 = vld [vmem:[#allocation5 + $0x6e0] ss:$20 sps:$4 sm:$0xff]   ;;  %v4895_v20 = vcombine.low %v317_v10, %v317_v10 }
  0xd9   : > { %2260 = vmatprep.subr.bf16.mxu0 %v4302_v21  ;;  %2563 = vmatprep.subr.bf16.mxu1 %v4305_v22  ;;  %v4386_v21 = vld [vmem:[#allocation5 + $0x6e8] ss:$20 sps:$4 sm:$0xff]   ;;  %v4391_v22 = vld [vmem:[#allocation5 + $0x70c] ss:$20 sps:$4 sm:$0xff]  }
  0xda   : > { %2199 = vmatprep.mubr.bf16.mxu0 %v4839_v23  ;;  %2502 = vmatprep.mubr.bf16.mxu1 %v4839_v23  ;;  %v4945_v10 = vld [vmem:[%s4799_s29 + $0xd0] ss:$24 sps:$4 sm:$0xff]  }
  0xdc   : > { %2261 = vmatpush1.bf16.msra.mxu0 %v4300_v24  ;;  %2564 = vmatpush1.bf16.msra.mxu1 %v4303_v25  ;;  %v4394_v24 = vld [vmem:[#allocation5 + $0x714] ss:$20 sps:$4 sm:$0xff]  }
  0xdd   : > { %2262 = vmatprep.subr.bf16.mxu0 %v4311_v26  ;;  %2565 = vmatprep.subr.bf16.mxu1 %v4314_v27  ;;  %v4389_v25 = vld [vmem:[#allocation5 + $0x708] ss:$20 sps:$4 sm:$0xff]   ;;  %v4392_v27 = vld [vmem:[#allocation5 + $0x710] ss:$20 sps:$4 sm:$0xff]  }
  0xde   : > { %v4898_v26 = vld [vmem:[%s4799_s29 + $0x14] ss:$24 sps:$4 sm:$0xff]  }
  0xdf   : > { %2200 = vmatmul.mubr.bf16.gmra.mrb[4].mxu0 %v4846_v28  ;;  %2503 = vmatmul.mubr.bf16.gmra.mrb[4].mxu1 %v4846_v28 }
  0xe0   : > { %2263 = vmatpush1.bf16.msra.mxu0 %v4309_v29  ;;  %2566 = vmatpush1.bf16.msra.mxu1 %v4312_v30  ;;  %v4397_v29 = vld [vmem:[#allocation5 + $0x734] ss:$20 sps:$4 sm:$0xff]   ;;  %v4400_v30 = vld [vmem:[#allocation5 + $0x73c] ss:$20 sps:$4 sm:$0xff]  }
  0xe1   : > { %2264 = vmatprep.subr.bf16.mxu0 %v4317_v31  ;;  %2567 = vmatprep.subr.bf16.mxu1 %v4320_v32  ;;  %v4395_v31 = vld [vmem:[#allocation5 + $0x730] ss:$20 sps:$4 sm:$0xff]   ;;  %v4398_v32 = vld [vmem:[#allocation5 + $0x738] ss:$20 sps:$4 sm:$0xff]  }
  0xe2   : > { %2209 = vmatprep.mubr.bf16.mxu0 %v4849_v33  ;;  %2512 = vmatprep.mubr.bf16.mxu1 %v4849_v33 }
  0xe4   : > { %2265 = vmatpush1.bf16.msra.mxu0 %v4315_v34  ;;  %2568 = vmatpush1.bf16.msra.mxu1 %v4318_v35  ;;  %v4403_v34 = vld [vmem:[#allocation5 + $0x75c] ss:$20 sps:$4 sm:$0xff]   ;;  %v4406_v35 = vld [vmem:[#allocation5 + $0x764] ss:$20 sps:$4 sm:$0xff]  }
  0xe5   : > { %2266 = vmatprep.subr.bf16.mxu0 %v4326_v36  ;;  %2569 = vmatprep.subr.bf16.mxu1 %v4329_v37  ;;  %v4401_v36 = vld [vmem:[#allocation5 + $0x758] ss:$20 sps:$4 sm:$0xff]   ;;  %v4404_v37 = vld [vmem:[#allocation5 + $0x760] ss:$20 sps:$4 sm:$0xff]  }
  0xe7   : > { %2210 = vmatmul.mubr.bf16.gmra.mrb[8].mxu0 %v4856_v38  ;;  %2513 = vmatmul.mubr.bf16.gmra.mrb[8].mxu1 %v4856_v38 }
  0xe8   : > { %2267 = vmatpush1.bf16.msra.mxu0 %v4324_v39  ;;  %2570 = vmatpush1.bf16.msra.mxu1 %v4327_v40  ;;  %v4410_v39 = vld [vmem:[#allocation5 + $0x150] ss:$20 sps:$4 sm:$0xff]  }
  0xe9   : > { %2268 = vmatprep.subr.bf16.mxu0 %v4332_v41  ;;  %2571 = vmatprep.subr.bf16.mxu1 %v4335_v42  ;;  %v4905_v40 = vld [vmem:[%s4799_s29 + $0x10] ss:$24 sps:$4 sm:$0xff]   ;;  %v4908_v42 = vld [vmem:[%s4799_s29 + $0x44] ss:$24 sps:$4 sm:$0xff]  }
  0xea   : > { %2219 = vmatprep.mubr.bf16.mxu0 %v4859_v44  ;;  %2522 = vmatprep.mubr.bf16.mxu1 %v4859_v44  ;;  %v4411_v41 = vld [vmem:[#allocation5 + $0x10] ss:$20 sps:$4 sm:$0xff]  }
  0xec   : > { %2269 = vmatpush1.bf16.msra.mxu0 %v4330_v43  ;;  %2572 = vmatpush1.bf16.msra.mxu1 %v4333_v45  ;;  %v4414_v43 = vld [vmem:[#allocation5 + $0x178] ss:$20 sps:$4 sm:$0xff]  }
  0xed   : > { %2270 = vmatprep.subr.bf16.mxu0 %v4341_v46  ;;  %2573 = vmatprep.subr.bf16.mxu1 %v4344_v48  ;;  %v4416_v45 = vld [vmem:[#allocation5 + $0x38] ss:$20 sps:$4 sm:$0xff]   ;;  %v4417_v46 = vld [vmem:[#allocation5 + $0x1a0] ss:$20 sps:$4 sm:$0xff]  }
  0xee   : > { %v4915_v48 = vld [vmem:[%s4799_s29 + $0x40] ss:$24 sps:$4 sm:$0xff]  }
  0xef   : > { %2220 = vmatmul.mubr.bf16.gmra.mrb[12].mxu0 %v4864_v47  ;;  %2523 = vmatmul.mubr.bf16.gmra.mrb[12].mxu1 %v4864_v47 }
  0xf0   : > { %2271 = vmatpush1.bf16.msra.mxu0 %v4339_v49  ;;  %2574 = vmatpush1.bf16.msra.mxu1 %v4342_v50  ;;  %v4918_v49 = vld [vmem:[%s4799_s29 + $0x74] ss:$24 sps:$4 sm:$0xff]  }
  0xf1   : > { %2272 = vmatprep.subr.bf16.mxu0 %v4347_v51  ;;  %2575 = vmatprep.subr.bf16.mxu1 %v4350_v52  ;;  %v4420_v50 = vld [vmem:[#allocation5 + $0x60] ss:$20 sps:$4 sm:$0xff]   ;;  %v4422_v51 = vld [vmem:[#allocation5 + $0x1c8] ss:$20 sps:$4 sm:$0xff]  }
  0xf2   : > { %2229 = vmatprep.mubr.bf16.mxu0 %v4869_v53  ;;  %2532 = vmatprep.mubr.bf16.mxu1 %v4869_v53  ;;  %v4423_v52 = vld [vmem:[#allocation5 + $0x88] ss:$20 sps:$4 sm:$0xff]  }
  0xf4   : > { %2273 = vmatpush1.bf16.msra.mxu0 %v4345_v54  ;;  %2576 = vmatpush1.bf16.msra.mxu1 %v4348_v55  ;;  %v4427_v54 = vld [vmem:[#allocation5 + $0x1f0] ss:$20 sps:$4 sm:$0xff]  }
  0xf5   : > { %2274 = vmatprep.subr.bf16.mxu0 %v4356_v57  ;;  %2577 = vmatprep.subr.bf16.mxu1 %v4359_v58  ;;  %v4925_v55 = vld [vmem:[%s4799_s29 + $0x70] ss:$24 sps:$4 sm:$0xff]   ;;  %v4928_v57 = vld [vmem:[%s4799_s29 + $0xa4] ss:$24 sps:$4 sm:$0xff]  }
  0xf6   : > { %v4428_v58 = vld [vmem:[#allocation5 + $0xb0] ss:$20 sps:$4 sm:$0xff]  }
  0xf7   : > { %2230 = vmatmul.mubr.bf16.gmra.mrb[16].mxu0 %v4874_v56  ;;  %2533 = vmatmul.mubr.bf16.gmra.mrb[16].mxu1 %v4874_v56 }
  0xf8   : > { %2275 = vmatpush1.bf16.msra.mxu0 %v4354_v60  ;;  %2578 = vmatpush1.bf16.msra.mxu1 %v4357_v61  ;;  %v4432_v60 = vld [vmem:[#allocation5 + $0x218] ss:$20 sps:$4 sm:$0xff]  }
  0xf9   : > { %2276 = vmatprep.subr.bf16.mxu0 %v4362_v62  ;;  %2579 = vmatprep.subr.bf16.mxu1 %v4365_v63  ;;  %v4433_v61 = vld [vmem:[#allocation5 + $0xd8] ss:$20 sps:$4 sm:$0xff]   ;;  %v4437_v62 = vld [vmem:[#allocation5 + $0x240] ss:$20 sps:$4 sm:$0xff]  }
  0xfa   : > { %2239 = vmatprep.mubr.bf16.mxu0 %v4879_v0  ;;  %2542 = vmatprep.mubr.bf16.mxu1 %v4879_v0  ;;  %v4935_v63 = vld [vmem:[%s4799_s29 + $0xa0] ss:$24 sps:$4 sm:$0xff]  }
  0xfc   : > { %2277 = vmatpush1.bf16.msra.mxu0 %v4360_v2  ;;  %2580 = vmatpush1.bf16.msra.mxu1 %v4363_v3  ;;  %v4938_v2 = vld [vmem:[%s4799_s29 + $0xd4] ss:$24 sps:$4 sm:$0xff]  }
  0xfd   : > { %2278 = vmatprep.subr.bf16.mxu0 %v4371_v4  ;;  %2581 = vmatprep.subr.bf16.mxu1 %v4374_v7  ;;  %v4438_v3 = vld [vmem:[#allocation5 + $0x100] ss:$20 sps:$4 sm:$0xff]   ;;  %v4441_v4 = vld [vmem:[#allocation5 + $0x268] ss:$20 sps:$4 sm:$0xff]  }
  0xfe   : > { %v4442_v7 = vld [vmem:[#allocation5 + $0x128] ss:$20 sps:$4 sm:$0xff]  }
  0xff   : > { %2240 = vmatmul.mubr.bf16.gmra.mrb[20].mxu0 %v4884_v6  ;;  %2543 = vmatmul.mubr.bf16.gmra.mrb[20].mxu1 %v4884_v6 }
 0x100   : > { %2279 = vmatpush1.bf16.msra.mxu0 %v4369_v8  ;;  %2582 = vmatpush1.bf16.msra.mxu1 %v4372_v9  ;;  %v4443_v8 = vld [vmem:[#allocation5 + $0x3d0] ss:$20 sps:$4 sm:$0xff]  }
 0x101   : > { %2280 = vmatprep.subr.bf16.mxu0 %v4377_v11  ;;  %2583 = vmatprep.subr.bf16.mxu1 %v4380_v12  ;;  %v4445_v9 = vld [vmem:[#allocation5 + $0x650] ss:$20 sps:$4 sm:$0xff]  }
 0x102   : > { %2249 = vmatprep.mubr.bf16.mxu0 %v4889_v14  ;;  %2552 = vmatprep.mubr.bf16.mxu1 %v4889_v14  ;;  %v4948_v11 = vld [vmem:[%s4799_s29 + $0x104] ss:$24 sps:$4 sm:$0xff]   ;;  %v318_v12 = vld [vmem:[%s4799_s29 + $0x130] sm:$0xff] }
 0x104   : > { %2281 = vmatpush1.bf16.msra.mxu0 %v4375_v13  ;;  %2584 = vmatpush1.bf16.msra.mxu1 %v4378_v15  ;;  %v4956_v13 = vld [vmem:[%s4799_s29 + $0x100] ss:$24 sps:$4 sm:$0xff]   ;;  %v4958_v15 = vcombine.high %v318_v12, %v318_v12 }
 0x105   : > { %2282 = vmatprep.subr.bf16.mxu0 %v4385_v16  ;;  %2585 = vmatprep.subr.bf16.mxu1 %v4388_v17  ;;  %v4964_v16 = vcombine.low %v318_v12, %v318_v12  ;;  %v4475_v17 = vld [vmem:[%s4799_s29 + $0x4] ss:$24 sps:$4 sm:$0xff]   ;;  %v4485_v12 = vld [vmem:[%s4799_s29 + $0x94] ss:$24 sps:$4 sm:$0xff]  }
 0x107   : > { %2250 = vmatmul.mubr.bf16.gmra.mrb[28].mxu0 %v4895_v20  ;;  %2553 = vmatmul.mubr.bf16.gmra.mrb[28].mxu1 %v4895_v20 }
 0x108   : > { %2283 = vmatpush1.bf16.msra.mxu0 %v4383_v19  ;;  %2586 = vmatpush1.bf16.msra.mxu1 %v4386_v21  ;;  %v4476_v19 = vld [vmem:[%s4799_s29 + $0xc4] ss:$24 sps:$4 sm:$0xff]  }
 0x109   : > { %2284 = vmatprep.subr.bf16.mxu0 %v4391_v22  ;;  %2587 = vmatprep.subr.bf16.mxu1 %v4394_v24  ;;  %v4444_v21 = vld [vmem:[#allocation5 + $0x290] ss:$20 sps:$4 sm:$0xff]   ;;  %v4447_v24 = vld [vmem:[#allocation5 + $0x3f8] ss:$20 sps:$4 sm:$0xff]  }
 0x10a   : > { %2290 = vmatprep.mubr.bf16.mxu0 %v4898_v26  ;;  %2593 = vmatprep.mubr.bf16.mxu1 %v4898_v26  ;;  %v4446_v22 = vld [vmem:[#allocation5 + $0x510] ss:$20 sps:$4 sm:$0xff]  }
 0x10c   : > { %2285 = vmatpush1.bf16.msra.mxu0 %v4389_v25  ;;  %2588 = vmatpush1.bf16.msra.mxu1 %v4392_v27  ;;  %v4449_v25 = vld [vmem:[#allocation5 + $0x678] ss:$20 sps:$4 sm:$0xff]   ;;  %v4477_v27 = vld [vmem:[%s4799_s29] ss:$24 sps:$4 sm:$0xff]  }
 0x10d   : > { %2286 = vmatprep.subr.bf16.mxu0 %v4397_v29  ;;  %2589 = vmatprep.subr.bf16.mxu1 %v4400_v30  ;;  %v4478_v29 = vld [vmem:[%s4799_s29 + $0xc0] ss:$24 sps:$4 sm:$0xff]   ;;  %v4448_v30 = vld [vmem:[#allocation5 + $0x2b8] ss:$20 sps:$4 sm:$0xff]  }
 0x110   : > { %2287 = vmatpush1.bf16.msra.mxu0 %v4395_v31  ;;  %2590 = vmatpush1.bf16.msra.mxu1 %v4398_v32  ;;  %v4450_v31 = vld [vmem:[#allocation5 + $0x538] ss:$20 sps:$4 sm:$0xff]   ;;  %v4451_v32 = vld [vmem:[#allocation5 + $0x420] ss:$20 sps:$4 sm:$0xff]  }
 0x111   : > { %2288 = vmatprep.subr.bf16.mxu0 %v4403_v34  ;;  %2591 = vmatprep.subr.bf16.mxu1 %v4406_v35  ;;  %v4453_v34 = vld [vmem:[#allocation5 + $0x6a0] ss:$20 sps:$4 sm:$0xff]  }
 0x112   : > { %v4479_v35 = vld [vmem:[%s4799_s29 + $0x34] ss:$24 sps:$4 sm:$0xff]  }
 0x114   : > { %2289 = vmatpush1.bf16.msra.mxu0 %v4401_v36  ;;  %2592 = vmatpush1.bf16.msra.mxu1 %v4404_v37  ;;  %v4480_v36 = vld [vmem:[%s4799_s29 + $0xf4] ss:$24 sps:$4 sm:$0xff]  }
 0x115   : > { %3899 = vmatprep.subr.bf16.mxu1 %v4410_v39  ;;  %3725 = vmatprep.subr.bf16.mxu0 %v4410_v39  ;;  %v4452_v37 = vld [vmem:[#allocation5 + $0x2e0] ss:$20 sps:$4 sm:$0xff]  }
 0x116   : > { %v4454_v39 = vld [vmem:[#allocation5 + $0x560] ss:$20 sps:$4 sm:$0xff]  }
 0x117   : > { %2291 = vmatmul.mubr.bf16.vlgmr.msra.gmra.mrb[0].mxu0 %v4905_v40  ;;  %2594 = vmatmul.mubr.bf16.vlgmr.msra.gmra.mrb[0].mxu1 %v4905_v40 }
 0x118   : > { %3907 = vmatpush3.bf16.msra.mxu1 %v4411_v41  ;;  %3726 = vmatpush3.bf16.msra.mxu0 %v4411_v41  ;;  %v4455_v41 = vld [vmem:[#allocation5 + $0x448] ss:$20 sps:$4 sm:$0xff]  }
 0x119   : > { %2300 = vmatprep.mubr.bf16.mxu0 %v4908_v42  ;;  %2603 = vmatprep.mubr.bf16.mxu1 %v4908_v42 }
 0x11a   : > { %3900 = vmatprep.subr.bf16.mxu1 %v4414_v43  ;;  %3727 = vmatprep.subr.bf16.mxu0 %v4414_v43  ;;  %v4457_v43 = vld [vmem:[#allocation5 + $0x6c8] ss:$20 sps:$4 sm:$0xff]  }
 0x11c   : > { %3908 = vmatpush3.bf16.msra.mxu1 %v4416_v45  ;;  %3728 = vmatpush3.bf16.msra.mxu0 %v4416_v45  ;;  %v4481_v45 = vld [vmem:[%s4799_s29 + $0x30] ss:$24 sps:$4 sm:$0xff]  }
 0x11d   : > { %3901 = vmatprep.subr.bf16.mxu1 %v4417_v46  ;;  %3729 = vmatprep.subr.bf16.mxu0 %v4417_v46  ;;  %v4482_v46 = vld [vmem:[%s4799_s29 + $0xf0] ss:$24 sps:$4 sm:$0xff]  }
 0x11f   : > { %2301 = vmatmul.mubr.bf16.gmra.mrb[4].mxu0 %v4915_v48  ;;  %2604 = vmatmul.mubr.bf16.gmra.mrb[4].mxu1 %v4915_v48 }
 0x120   : > { %2310 = vmatprep.mubr.bf16.mxu0 %v4918_v49  ;;  %2613 = vmatprep.mubr.bf16.mxu1 %v4918_v49 }
 0x121   : > { %3909 = vmatpush3.bf16.msra.mxu1 %v4420_v50  ;;  %3730 = vmatpush3.bf16.msra.mxu0 %v4420_v50  ;;  %v4456_v50 = vld [vmem:[#allocation5 + $0x308] ss:$20 sps:$4 sm:$0xff]  }
 0x122   : > { %3902 = vmatprep.subr.bf16.mxu1 %v4422_v51  ;;  %3731 = vmatprep.subr.bf16.mxu0 %v4422_v51  ;;  %v4458_v51 = vld [vmem:[#allocation5 + $0x588] ss:$20 sps:$4 sm:$0xff]  }
 0x125   : > { %3910 = vmatpush3.bf16.msra.mxu1 %v4423_v52  ;;  %3732 = vmatpush3.bf16.msra.mxu0 %v4423_v52  ;;  %v4459_v52 = vld [vmem:[#allocation5 + $0x470] ss:$20 sps:$4 sm:$0xff]  }
 0x126   : > { %3903 = vmatprep.subr.bf16.mxu1 %v4427_v54  ;;  %3733 = vmatprep.subr.bf16.mxu0 %v4427_v54  ;;  %v4461_v54 = vld [vmem:[#allocation5 + $0x6f0] ss:$20 sps:$4 sm:$0xff]  }
 0x127   : > { %2311 = vmatmul.mubr.bf16.gmra.mrb[8].mxu0 %v4925_v55  ;;  %2614 = vmatmul.mubr.bf16.gmra.mrb[8].mxu1 %v4925_v55 }
 0x128   : > { %2320 = vmatprep.mubr.bf16.mxu0 %v4928_v57  ;;  %2623 = vmatprep.mubr.bf16.mxu1 %v4928_v57 }
 0x129   : > { %3911 = vmatpush3.bf16.msra.mxu1 %v4428_v58  ;;  %3734 = vmatpush3.bf16.msra.mxu0 %v4428_v58  ;;  %v4483_v58 = vld [vmem:[%s4799_s29 + $0x64] ss:$24 sps:$4 sm:$0xff]  }
 0x12a   : > { %3904 = vmatprep.subr.bf16.mxu1 %v4432_v60  ;;  %3735 = vmatprep.subr.bf16.mxu0 %v4432_v60  ;;  %v4460_v60 = vld [vmem:[#allocation5 + $0x330] ss:$20 sps:$4 sm:$0xff]  }
 0x12d   : > { %3912 = vmatpush3.bf16.msra.mxu1 %v4433_v61  ;;  %3736 = vmatpush3.bf16.msra.mxu0 %v4433_v61  ;;  %v4462_v61 = vld [vmem:[#allocation5 + $0x5b0] ss:$20 sps:$4 sm:$0xff]  }
 0x12e   : > { %3905 = vmatprep.subr.bf16.mxu1 %v4437_v62  ;;  %3737 = vmatprep.subr.bf16.mxu0 %v4437_v62  ;;  %v4463_v62 = vld [vmem:[#allocation5 + $0x498] ss:$20 sps:$4 sm:$0xff]  }
 0x12f   : > { %2321 = vmatmul.mubr.bf16.gmra.mrb[12].mxu0 %v4935_v63  ;;  %2624 = vmatmul.mubr.bf16.gmra.mrb[12].mxu1 %v4935_v63 }
 0x130   : > { %2330 = vmatprep.mubr.bf16.mxu0 %v4938_v2  ;;  %2633 = vmatprep.mubr.bf16.mxu1 %v4938_v2 }
 0x131   : > { %3913 = vmatpush3.bf16.msra.mxu1 %v4438_v3  ;;  %3738 = vmatpush3.bf16.msra.mxu0 %v4438_v3  ;;  %v4465_v3 = vld [vmem:[#allocation5 + $0x718] ss:$20 sps:$4 sm:$0xff]  }
 0x132   : > { %3906 = vmatprep.subr.bf16.mxu1 %v4441_v4  ;;  %3739 = vmatprep.subr.bf16.mxu0 %v4441_v4  ;;  %v4484_v4 = vld [vmem:[%s4799_s29 + $0x60] ss:$24 sps:$4 sm:$0xff]  }
 0x135   : > { %3914 = vmatpush3.bf16.msra.mxu1 %v4442_v7  ;;  %3740 = vmatpush3.bf16.msra.mxu0 %v4442_v7  ;;  %v4464_v7 = vld [vmem:[#allocation5 + $0x358] ss:$20 sps:$4 sm:$0xff]  }
 0x136   : > { %3783 = vmatprep.subr.bf16.mxu1 %v4443_v8  ;;  %3841 = vmatprep.subr.bf16.mxu0 %v4445_v9  ;;  %v4466_v8 = vld [vmem:[#allocation5 + $0x5d8] ss:$20 sps:$4 sm:$0xff]   ;;  %v4469_v9 = vld [vmem:[#allocation5 + $0x740] ss:$20 sps:$4 sm:$0xff]  }
 0x137   : > { %2331 = vmatmul.mubr.bf16.gmra.mrb[16].mxu0 %v4945_v10  ;;  %2634 = vmatmul.mubr.bf16.gmra.mrb[16].mxu1 %v4945_v10 }
 0x138   : > { %2340 = vmatprep.mubr.bf16.mxu0 %v4948_v11  ;;  %2643 = vmatprep.mubr.bf16.mxu1 %v4948_v11 }
 0x13f   : > { %2341 = vmatmul.mubr.bf16.gmra.mrb[20].mxu0 %v4956_v13  ;;  %2644 = vmatmul.mubr.bf16.gmra.mrb[20].mxu1 %v4956_v13 }
 0x140   : > { %2350 = vmatprep.mubr.bf16.mxu0 %v4958_v15  ;;  %2653 = vmatprep.mubr.bf16.mxu1 %v4958_v15 }
 0x147   : > { %2351 = vmatmul.mubr.bf16.gmra.mrb[32].mxu0 %v4964_v16  ;;  %2654 = vmatmul.mubr.bf16.gmra.mrb[32].mxu1 %v4964_v16 }
 0x148   : > { %2694 = vmatprep.mubr.bf16.mxu0 %v4475_v17  ;;  %2726 = vmatprep.mubr.bf16.mxu1 %v4476_v19  ;;  %v4468_v17 = vld [vmem:[#allocation5 + $0x380] ss:$20 sps:$4 sm:$0xff]  }
 0x149   : > { %v4470_v19 = vld [vmem:[#allocation5 + $0x600] ss:$20 sps:$4 sm:$0xff]  }
 0x14f   : > { %2695 = vmatmul.mubr.bf16.vlgmr.msra.gmra.mrb[36].mxu0 %v4477_v27  ;;  %2727 = vmatmul.mubr.bf16.vlgmr.msra.gmra.mrb[36].mxu1 %v4478_v29 }
 0x150   : > { %3784 = vmatpush3.bf16.msra.mxu1 %v4444_v21  ;;  %3842 = vmatpush3.bf16.msra.mxu0 %v4446_v22  ;;  %v4473_v21 = vld [vmem:[#allocation5 + $0x768] ss:$20 sps:$4 sm:$0xff]   ;;  %v4486_v22 = vld [vmem:[%s4799_s29 + $0x90] ss:$24 sps:$4 sm:$0xff]   ;;  %s278_s29 = scalar_lea.vmem %s5303_s4, %s3435_s15  ;;  %s5251_s15 = scalar_lea.hbm %s5304_s5, %s4015_s26 }
 0x151   : > { %3785 = vmatprep.subr.bf16.mxu1 %v4447_v24  ;;  %3843 = vmatprep.subr.bf16.mxu0 %v4449_v25  ;;  %v4472_v24 = vld [vmem:[#allocation5 + $0x3a8] ss:$20 sps:$4 sm:$0xff]  }
 0x152   : > { %2702 = vmatprep.mubr.bf16.mxu0 %v4479_v35  ;;  %2734 = vmatprep.mubr.bf16.mxu1 %v4480_v36  ;;  %v4474_v25 = vld [vmem:[#allocation5 + $0x628] ss:$20 sps:$4 sm:$0xff]  }
 0x154   : > { %3786 = vmatpush3.bf16.msra.mxu1 %v4448_v30  ;;  %3844 = vmatpush3.bf16.msra.mxu0 %v4450_v31 }
 0x155   : > { %3787 = vmatprep.subr.bf16.mxu1 %v4451_v32  ;;  %3845 = vmatprep.subr.bf16.mxu0 %v4453_v34 }
 0x157   : > { %2703 = vmatmul.mubr.bf16.gmra.mrb[40].mxu0 %v4481_v45  ;;  %2735 = vmatmul.mubr.bf16.gmra.mrb[40].mxu1 %v4482_v46 }
 0x158   : > { %3788 = vmatpush3.bf16.msra.mxu1 %v4452_v37  ;;  %3846 = vmatpush3.bf16.msra.mxu0 %v4454_v39 }
 0x159   : > { %3789 = vmatprep.subr.bf16.mxu1 %v4455_v41  ;;  %3847 = vmatprep.subr.bf16.mxu0 %v4457_v43 }
 0x15a   : > { %2710 = vmatprep.mubr.bf16.mxu0 %v4483_v58  ;;  %2742 = vmatprep.mubr.bf16.mxu1 %v4822_v59  ;;  %v4467_v59 = vld [vmem:[#allocation5 + $0x4c0] ss:$20 sps:$4 sm:$0xff]  }
 0x15c   : > { %3790 = vmatpush3.bf16.msra.mxu1 %v4456_v50  ;;  %3848 = vmatpush3.bf16.msra.mxu0 %v4458_v51 }
 0x15d   : > { %3791 = vmatprep.subr.bf16.mxu1 %v4459_v52  ;;  %3849 = vmatprep.subr.bf16.mxu0 %v4461_v54 }
 0x15f   : > { %2711 = vmatmul.mubr.bf16.gmra.mrb[44].mxu0 %v4484_v4  ;;  %2743 = vmatmul.mubr.bf16.gmra.mrb[44].mxu1 %v4826_v1  ;;  %v4471_v1 = vld [vmem:[#allocation5 + $0x4e8] ss:$20 sps:$4 sm:$0xff]  }
 0x160   : > { %3792 = vmatpush3.bf16.msra.mxu1 %v4460_v60  ;;  %3850 = vmatpush3.bf16.msra.mxu0 %v4462_v61 }
 0x161   : > { %3793 = vmatprep.subr.bf16.mxu1 %v4463_v62  ;;  %3851 = vmatprep.subr.bf16.mxu0 %v4465_v3 }
 0x162   : > { %2718 = vmatprep.mubr.bf16.mxu0 %v4485_v12  ;;  %2782 = vmatprep.mubr.bf16.mxu1 %v4829_v5 }
 0x164   : > { %3794 = vmatpush3.bf16.msra.mxu1 %v4464_v7  ;;  %3852 = vmatpush3.bf16.msra.mxu0 %v4466_v8  ;;  %v5025_v7 = vld [vmem:[%s5301_s2] ss:$0 sm:$0xff]  ;;  %v5030_v8 = vld [vmem:[%s5301_s2 + $0x1] ss:$0 sm:$0xff] }
 0x165   : > { %3795 = vmatprep.subr.bf16.mxu1 %v4467_v59  ;;  %3853 = vmatprep.subr.bf16.mxu0 %v4469_v9 }
 0x167   : > { %2719 = vmatmul.mubr.bf16.gmra.mrb[48].mxu0 %v4486_v22 }
 0x168   : > { %3796 = vmatpush3.bf16.msra.mxu1 %v4468_v17  ;;  %3854 = vmatpush3.bf16.msra.mxu0 %v4470_v19 }
 0x169   : > { %3797 = vmatprep.subr.bf16.mxu1 %v4471_v1  ;;  %3855 = vmatprep.subr.bf16.mxu0 %v4473_v21 }
 0x16a   : > { %2870 = vmatprep.mubr.bf16.mxu0 %v4898_v26 }
 0x16c   : > { %3798 = vmatpush3.bf16.msra.mxu1 %v4472_v24  ;;  %3856 = vmatpush3.bf16.msra.mxu0 %v4474_v25 }
 0x16f   : > { %2783 = vmatmul.mubr.bf16.vlgmr.msra.gmra.mrb[48].mxu1 %v4836_v18  ;;  %2871 = vmatmul.mubr.bf16.vlgmr.msra.gmra.mrb[52].mxu0 %v4905_v40 }
 0x170   : > { %2790 = vmatprep.mubr.bf16.mxu1 %v4839_v23  ;;  %2878 = vmatprep.mubr.bf16.mxu0 %v4908_v42 }
 0x177   : > { %2791 = vmatmul.mubr.bf16.gmra.mrb[52].mxu1 %v4846_v28  ;;  %2879 = vmatmul.mubr.bf16.gmra.mrb[56].mxu0 %v4915_v48 }
 0x178   : > { %2798 = vmatprep.mubr.bf16.mxu1 %v4849_v33  ;;  %2886 = vmatprep.mubr.bf16.mxu0 %v4918_v49 }
 0x17f   : > { %2799 = vmatmul.mubr.bf16.gmra.mrb[56].mxu1 %v4856_v38  ;;  %2887 = vmatmul.mubr.bf16.gmra.mrb[60].mxu0 %v4925_v55 }
 0x180   : > { %2806 = vmatprep.mubr.bf16.mxu1 %v4859_v44  ;;  %2894 = vmatprep.mubr.bf16.mxu0 %v4928_v57 }
 0x187   : > { %2807 = vmatmul.mubr.bf16.gmra.mrb[60].mxu1 %v4864_v47  ;;  %2895 = vmatmul.mubr.bf16.gmra.mrb[64].mxu0 %v4935_v63 }
 0x188   : > { %2814 = vmatprep.mubr.bf16.mxu1 %v4869_v53  ;;  %2902 = vmatprep.mubr.bf16.mxu0 %v4938_v2 }
 0x18f   : > { %2815 = vmatmul.mubr.bf16.gmra.mrb[64].mxu1 %v4874_v56  ;;  %2903 = vmatmul.mubr.bf16.gmra.mrb[68].mxu0 %v4945_v10 }
 0x190   : > { %2822 = vmatprep.mubr.bf16.mxu1 %v4879_v0  ;;  %2910 = vmatprep.mubr.bf16.mxu0 %v4948_v11 }
 0x197   : > { %2823 = vmatmul.mubr.bf16.gmra.mrb[68].mxu1 %v4884_v6  ;;  %2911 = vmatmul.mubr.bf16.gmra.mrb[72].mxu0 %v4956_v13 }
 0x198   : > { %2830 = vmatprep.mubr.bf16.mxu1 %v4889_v14  ;;  %2918 = vmatprep.mubr.bf16.mxu0 %v4958_v15 }
 0x19a   : > { %v2453_v5 = vpop.f32.mrb[24].mxu1  ;;  %v2150_v18 = vpop.f32.mrb[24].mxu0 }
 0x19b   : > { %v2455_v23 = vpop.f32.mrb[25].mxu1  ;;  %v2152_v28 = vpop.f32.mrb[25].mxu0 }
 0x19c   : > { %v2457_v33 = vpop.f32.mrb[26].mxu1  ;;  %v2154_v38 = vpop.f32.mrb[26].mxu0 }
 0x19d   : > { %v2458_v44 = vpop.f32.mrb[27].mxu1  ;;  %v2155_v47 = vpop.f32.mrb[27].mxu0 }
 0x19f   : > { %2831 = vmatmul.mubr.bf16.gmra.mrb[72].mxu1 %v4895_v20  ;;  %2919 = vmatmul.mubr.bf16.gmra.mrb[76].mxu0 %v4964_v16 }
 0x1da   : > { %v2251_v53 = vpop.f32.mrb[28].mxu0  ;;  %v2554_v56 = vpop.f32.mrb[28].mxu1 }
 0x1db   : > { %v5010_v0 = vadd.f32 %v2251_v53, %v2150_v18  ;;  %v5012_v6 = vadd.f32 %v2554_v56, %v2453_v5  ;;  %v2253_v14 = vpop.f32.mrb[29].mxu0  ;;  %v2556_v26 = vpop.f32.mrb[29].mxu1 }
 0x1dc   : > { %v5014_v40 = vadd.f32 %v2253_v14, %v2152_v28  ;;  %v5016_v42 = vadd.f32 %v2556_v26, %v2455_v23  ;;  %v2558_v48 = vpop.f32.mrb[30].mxu1  ;;  %v2255_v49 = vpop.f32.mrb[30].mxu0 }
 0x1dd   : > { %v2559_v55 = vpop.f32.mrb[31].mxu1  ;;  %v2256_v57 = vpop.f32.mrb[31].mxu0 }
 0x1ea   : > { %v2292_v63 = vpop.f32.mrb[0].mxu0  ;;  %v2595_v20 = vpop.f32.mrb[0].mxu1 }
 0x1eb   : > { %v2294_v2 = vpop.f32.mrb[1].mxu0  ;;  %v2597_v10 = vpop.f32.mrb[1].mxu1 }
 0x1ec   : > { %v2296_v11 = vpop.f32.mrb[2].mxu0  ;;  %v2599_v13 = vpop.f32.mrb[2].mxu1  ;;  %v2971_v27 = vrot.slane %v2294_v2, 1  ;;  %v3066_v29 = vrot.slane %v2597_v10, 1 }
 0x1ed   : > { %v2298_v15 = vpop.f32.mrb[3].mxu0  ;;  %v2601_v16 = vpop.f32.mrb[3].mxu1 }
 0x1ee   : > { %v2972_v30 = vrot.slane %v2298_v15, 1  ;;  %v3067_v31 = vrot.slane %v2601_v16, 1 }
 0x1f0   : > { %v2973_v32 = vsel %vm2970_vm0, %v2971_v27, %v2972_v30  ;;  %v3068_v34 = vsel %vm2970_vm0, %v3066_v29, %v3067_v31 }
 0x1f1   : > { %v3009_v35 = vadd.f32 %v2973_v32, %v2292_v63  ;;  %v3104_v36 = vadd.f32 %v3068_v34, %v2595_v20 }
 0x1f2   : > { %v2302_v37 = vpop.f32.mrb[4].mxu0  ;;  %v2605_v39 = vpop.f32.mrb[4].mxu1 }
 0x1f3   : > { %v2304_v41 = vpop.f32.mrb[5].mxu0  ;;  %v2607_v43 = vpop.f32.mrb[5].mxu1  ;;  %v3027_v21 = vadd.f32 %v5025_v7, %v3009_v35  ;;  %v3122_v22 = vadd.f32 %v5030_v8, %v3104_v36 }
 0x1f4   : > { %v2974_v45 = vrot.slane %v2304_v41, 1  ;;  %v3069_v46 = vrot.slane %v2607_v43, 1  ;;  %v2306_v50 = vpop.f32.mrb[6].mxu0  ;;  %v2609_v51 = vpop.f32.mrb[6].mxu1 }
 0x1f5   : > { %v2308_v52 = vpop.f32.mrb[7].mxu0  ;;  %v2611_v54 = vpop.f32.mrb[7].mxu1  ;;  %v5038_v14 = vmax.f32 %v3027_v21, 0.0  ;;  %v5040_v26 = vmax.f32 %v3122_v22, 0.0 }
 0x1f6   : > { %v2975_v58 = vsel %vm2970_vm0, %v2972_v30, %v2974_v45  ;;  %v3070_v60 = vsel %vm2970_vm0, %v3067_v31, %v3069_v46  ;;  %v2976_v61 = vrot.slane %v2308_v52, 1  ;;  %v3071_v62 = vrot.slane %v2611_v54, 1 }
 0x1f7   : > { %v3010_v3 = vadd.f32 %v2975_v58, %v2296_v11  ;;  %v3105_v4 = vadd.f32 %v3070_v60, %v2599_v13  ;;  %v3149_v13 = vsel %vm3148_vm1, %v5038_v14, -inf  ;;  %v3211_v16 = vsel %vm3148_vm1, %v5040_v26, -inf }
 0x1f8   : > { %v2977_v59 = vsel %vm2970_vm0, %v2974_v45, %v2976_v61  ;;  %v3072_v9 = vsel %vm2970_vm0, %v3069_v46, %v3071_v62 }
 0x1f9   : > { %v3011_v12 = vadd.f32 %v2977_v59, %v2302_v37  ;;  %v3106_v17 = vadd.f32 %v3072_v9, %v2605_v39  ;;  %v3028_v30 = vadd.f32 %v5025_v7, %v3010_v3  ;;  %v3123_v31 = vadd.f32 %v5030_v8, %v3105_v4 }
 0x1fa   : > { %v2312_v19 = vpop.f32.mrb[8].mxu0  ;;  %v2615_v1 = vpop.f32.mrb[8].mxu1 }
 0x1fb   : > { %v2314_v24 = vpop.f32.mrb[9].mxu0  ;;  %v2617_v25 = vpop.f32.mrb[9].mxu1  ;;  %v3029_v37 = vadd.f32 %v5025_v7, %v3011_v12  ;;  %v3124_v39 = vadd.f32 %v5030_v8, %v3106_v17 }
 0x1fc   : > { %v2978_v5 = vrot.slane %v2314_v24, 1  ;;  %v3073_v18 = vrot.slane %v2617_v25, 1  ;;  %v2316_v23 = vpop.f32.mrb[10].mxu0  ;;  %v2619_v28 = vpop.f32.mrb[10].mxu1 }
 0x1fd   : > { %v2318_v33 = vpop.f32.mrb[11].mxu0  ;;  %v2621_v38 = vpop.f32.mrb[11].mxu1  ;;  %v3042_v21 = vmax.f32 %v3029_v37, 0.0  ;;  %v3137_v22 = vmax.f32 %v3124_v39, 0.0 }
 0x1fe   : > { %v2979_v44 = vsel %vm2970_vm0, %v2976_v61, %v2978_v5  ;;  %v3074_v47 = vsel %vm2970_vm0, %v3071_v62, %v3073_v18  ;;  %v2980_v53 = vrot.slane %v2318_v33, 1  ;;  %v3075_v56 = vrot.slane %v2621_v38, 1 }
 0x1ff   : > { %v3012_v48 = vadd.f32 %v2979_v44, %v2306_v50  ;;  %v3107_v49 = vadd.f32 %v3074_v47, %v2609_v51 }
 0x200   : > { %v2981_v55 = vsel %vm2970_vm0, %v2978_v5, %v2980_v53  ;;  %v3076_v57 = vsel %vm2970_vm0, %v3073_v18, %v3075_v56 }
 0x201   : > { %v3013_v63 = vadd.f32 %v2981_v55, %v2312_v19  ;;  %v3108_v20 = vadd.f32 %v3076_v57, %v2615_v1  ;;  %v3041_v19 = vmax.f32 %v3028_v30, 0.0  ;;  %v3136_v1 = vmax.f32 %v3123_v31, 0.0 }
 0x202   : > { %v2322_v2 = vpop.f32.mrb[12].mxu0  ;;  %v2625_v10 = vpop.f32.mrb[12].mxu1  ;;  %v3030_v44 = vadd.f32 %v5025_v7, %v3012_v48  ;;  %v3125_v47 = vadd.f32 %v5030_v8, %v3107_v49 }
 0x203   : > { %v3031_v11 = vadd.f32 %v5025_v7, %v3013_v63  ;;  %v3126_v15 = vadd.f32 %v5030_v8, %v3108_v20  ;;  %v2324_v27 = vpop.f32.mrb[13].mxu0  ;;  %v2627_v29 = vpop.f32.mrb[13].mxu1 }
 0x204   : > { %v2982_v32 = vrot.slane %v2324_v27, 1  ;;  %v3077_v34 = vrot.slane %v2627_v29, 1  ;;  %v2326_v35 = vpop.f32.mrb[14].mxu0  ;;  %v2629_v36 = vpop.f32.mrb[14].mxu1 }
 0x205   : > { %v3044_v41 = vmax.f32 %v3031_v11, 0.0  ;;  %v3139_v43 = vmax.f32 %v3126_v15, 0.0  ;;  %v2328_v45 = vpop.f32.mrb[15].mxu0  ;;  %v2631_v46 = vpop.f32.mrb[15].mxu1 }
 0x206   : > { %v2983_v50 = vsel %vm2970_vm0, %v2980_v53, %v2982_v32  ;;  %v3078_v51 = vsel %vm2970_vm0, %v3075_v56, %v3077_v34  ;;  %v2984_v52 = vrot.slane %v2328_v45, 1  ;;  %v3079_v54 = vrot.slane %v2631_v46, 1 }
 0x207   : > { %v5054_v58 = vmax.f32 %v3149_v13, %v3044_v41  ;;  %v5056_v60 = vmax.f32 %v3211_v16, %v3139_v43  ;;  %v3014_v61 = vadd.f32 %v2983_v50, %v2316_v23  ;;  %v3109_v62 = vadd.f32 %v3078_v51, %v2619_v28 }
 0x208   : > { %v2985_v3 = vsel %vm2970_vm0, %v2982_v32, %v2984_v52  ;;  %v3080_v4 = vsel %vm2970_vm0, %v3077_v34, %v3079_v54  ;;  %v3043_v45 = vmax.f32 %v3030_v44, 0.0  ;;  %v3138_v46 = vmax.f32 %v3125_v47, 0.0 }
 0x209   : > { %v3032_v59 = vadd.f32 %v5025_v7, %v3014_v61  ;;  %v3127_v9 = vadd.f32 %v5030_v8, %v3109_v62  ;;  %v3015_v12 = vadd.f32 %v2985_v3, %v2322_v2  ;;  %v3110_v17 = vadd.f32 %v3080_v4, %v2625_v10 }
 0x20a   : > { %v2332_v24 = vpop.f32.mrb[16].mxu0  ;;  %v2635_v25 = vpop.f32.mrb[16].mxu1 }
 0x20b   : > { %v3045_v5 = vmax.f32 %v3032_v59, 0.0  ;;  %v3140_v18 = vmax.f32 %v3127_v9, 0.0  ;;  %v3033_v23 = vadd.f32 %v5025_v7, %v3015_v12  ;;  %v3128_v28 = vadd.f32 %v5030_v8, %v3110_v17  ;;  %v2334_v33 = vpop.f32.mrb[17].mxu0  ;;  %v2637_v38 = vpop.f32.mrb[17].mxu1 }
 0x20c   : > { %v2986_v53 = vrot.slane %v2334_v33, 1  ;;  %v3081_v56 = vrot.slane %v2637_v38, 1  ;;  %v2336_v55 = vpop.f32.mrb[18].mxu0  ;;  %v2639_v57 = vpop.f32.mrb[18].mxu1 }
 0x20d   : > { %v5066_v63 = vmax.f32 %v3041_v19, %v3045_v5  ;;  %v5068_v20 = vmax.f32 %v3136_v1, %v3140_v18  ;;  %v3046_v2 = vmax.f32 %v3033_v23, 0.0  ;;  %v3141_v10 = vmax.f32 %v3128_v28, 0.0  ;;  %v2338_v11 = vpop.f32.mrb[19].mxu0  ;;  %v2641_v13 = vpop.f32.mrb[19].mxu1 }
 0x20e   : > { %v2987_v15 = vsel %vm2970_vm0, %v2984_v52, %v2986_v53  ;;  %v3082_v16 = vsel %vm2970_vm0, %v3079_v54, %v3081_v56  ;;  %v2988_v27 = vrot.slane %v2338_v11, 1  ;;  %v3083_v48 = vrot.slane %v2641_v13, 1 }
 0x20f   : > { %v5072_v29 = vmax.f32 %v3042_v21, %v3046_v2  ;;  %v5074_v49 = vmax.f32 %v3137_v22, %v3141_v10  ;;  %v3016_v30 = vadd.f32 %v2987_v15, %v2326_v35  ;;  %v3111_v31 = vadd.f32 %v3082_v16, %v2629_v36 }
 0x210   : > { %v2989_v32 = vsel %vm2970_vm0, %v2986_v53, %v2988_v27  ;;  %v3084_v34 = vsel %vm2970_vm0, %v3081_v56, %v3083_v48 }
 0x211   : > { %v3034_v37 = vadd.f32 %v5025_v7, %v3016_v30  ;;  %v3129_v39 = vadd.f32 %v5030_v8, %v3111_v31  ;;  %v3017_v41 = vadd.f32 %v2989_v32, %v2332_v24  ;;  %v3112_v43 = vadd.f32 %v3084_v34, %v2635_v25 }
 0x212   : > { %v2342_v50 = vpop.f32.mrb[20].mxu0  ;;  %v2645_v51 = vpop.f32.mrb[20].mxu1 }
 0x213   : > { %v3047_v52 = vmax.f32 %v3034_v37, 0.0  ;;  %v3142_v54 = vmax.f32 %v3129_v39, 0.0  ;;  %v3035_v61 = vadd.f32 %v5025_v7, %v3017_v41  ;;  %v3130_v35 = vadd.f32 %v5030_v8, %v3112_v43  ;;  %v2344_v36 = vpop.f32.mrb[21].mxu0  ;;  %v2647_v62 = vpop.f32.mrb[21].mxu1 }
 0x214   : > { %v2990_v3 = vrot.slane %v2344_v36, 1  ;;  %v3085_v4 = vrot.slane %v2647_v62, 1  ;;  %v2346_v59 = vpop.f32.mrb[22].mxu0  ;;  %v2649_v9 = vpop.f32.mrb[22].mxu1 }
 0x215   : > { %v5082_v12 = vmax.f32 %v3043_v45, %v3047_v52  ;;  %v5084_v17 = vmax.f32 %v3138_v46, %v3142_v54  ;;  %v3048_v19 = vmax.f32 %v3035_v61, 0.0  ;;  %v3143_v1 = vmax.f32 %v3130_v35, 0.0  ;;  %v2348_v21 = vpop.f32.mrb[23].mxu0  ;;  %v2651_v22 = vpop.f32.mrb[23].mxu1 }
 0x216   : > { %v2991_v24 = vsel %vm2970_vm0, %v2988_v27, %v2990_v3  ;;  %v3086_v25 = vsel %vm2970_vm0, %v3083_v48, %v3085_v4  ;;  %v2992_v5 = vrot.slane %v2348_v21, 1  ;;  %v3087_v18 = vrot.slane %v2651_v22, 1 }
 0x217   : > { %v5089_v23 = vmax.f32 %v5054_v58, %v3048_v19  ;;  %v5092_v28 = vmax.f32 %v5056_v60, %v3143_v1  ;;  %v3018_v33 = vadd.f32 %v2991_v24, %v2336_v55  ;;  %v3113_v38 = vadd.f32 %v3086_v25, %v2639_v57 }
 0x218   : > { %v2993_v44 = vsel %vm2970_vm0, %v2990_v3, %v2992_v5  ;;  %v3088_v47 = vsel %vm2970_vm0, %v3085_v4, %v3087_v18 }
 0x219   : > { %v3036_v53 = vadd.f32 %v5025_v7, %v3018_v33  ;;  %v3131_v56 = vadd.f32 %v5030_v8, %v3113_v38  ;;  %v3019_v2 = vadd.f32 %v2993_v44, %v2342_v50  ;;  %v3114_v10 = vadd.f32 %v3088_v47, %v2645_v51 }
 0x21a   : > { %v2352_v11 = vpop.f32.mrb[32].mxu0  ;;  %v2655_v13 = vpop.f32.mrb[32].mxu1 }
 0x21b   : > { %v3049_v15 = vmax.f32 %v3036_v53, 0.0  ;;  %v3144_v58 = vmax.f32 %v3131_v56, 0.0  ;;  %v3037_v16 = vadd.f32 %v5025_v7, %v3019_v2  ;;  %v3132_v60 = vadd.f32 %v5030_v8, %v3114_v10  ;;  %v2354_v55 = vpop.f32.mrb[33].mxu0  ;;  %v2657_v57 = vpop.f32.mrb[33].mxu1 }
 0x21c   : > { %v2353_v27 = vadd.f32 %v2352_v11, %v5010_v0  ;;  %v2656_v48 = vadd.f32 %v2655_v13, %v5012_v6  ;;  %v2355_v30 = vadd.f32 %v2354_v55, %v5014_v40  ;;  %v2658_v31 = vadd.f32 %v2657_v57, %v5016_v42  ;;  %v2356_v32 = vpop.f32.mrb[34].mxu0  ;;  %v2659_v34 = vpop.f32.mrb[34].mxu1 }
 0x21d   : > { %v3155_v37 = vmax.f32 %v5066_v63, %v3049_v15  ;;  %v3217_v39 = vmax.f32 %v5068_v20, %v3144_v58  ;;  %v3050_v41 = vmax.f32 %v3037_v16, 0.0  ;;  %v3145_v43 = vmax.f32 %v3132_v60, 0.0  ;;  %v2357_v45 = vpop.f32.mrb[35].mxu0  ;;  %v2660_v46 = vpop.f32.mrb[35].mxu1 }
 0x21e   : > { %v2994_v50 = vrot.slane %v2355_v30, 1  ;;  %v3089_v51 = vrot.slane %v2658_v31, 1 }
 0x21f   : > { %v3156_v0 = vmax.f32 %v5072_v29, %v3050_v41  ;;  %v3218_v6 = vmax.f32 %v5074_v49, %v3145_v43 }
 0x220   : > { %v2995_v40 = vsel %vm2970_vm0, %v2992_v5, %v2994_v50  ;;  %v3021_v52 = vadd.f32 %v2994_v50, %v2353_v27  ;;  %v3090_v42 = vsel %vm2970_vm0, %v3087_v18, %v3089_v51  ;;  %v3116_v54 = vadd.f32 %v3089_v51, %v2656_v48 }
 0x221   : > { %v3020_v61 = vadd.f32 %v2995_v40, %v2346_v59  ;;  %v3115_v63 = vadd.f32 %v3090_v42, %v2649_v9 }
 0x222   : > { %v3039_v20 = vadd.f32 %v5025_v7, %v3021_v52  ;;  %v3134_v35 = vadd.f32 %v5030_v8, %v3116_v54  ;;  %v3741_v36 = vpop.f32.mrb[36].mxu0  ;;  %v3765_v62 = vpop.f32.mrb[36].mxu1 }
 0x223   : > { %v3038_v3 = vadd.f32 %v5025_v7, %v3020_v61  ;;  %v3133_v29 = vadd.f32 %v5030_v8, %v3115_v63  ;;  %v3742_v49 = vpop.f32.mrb[37].mxu0  ;;  %v3766_v4 = vpop.f32.mrb[37].mxu1 }
 0x224   : > { %v5114_v19 = vmax.f32 %v3039_v20, 0.0  ;;  %v5116_v1 = vmax.f32 %v3134_v35, 0.0  ;;  %v5118_v21 = vadd.f32 %v3742_v49, %v3741_v36  ;;  %v5120_v59 = vadd.f32 %v3766_v4, %v3765_v62  ;;  %v3744_v9 = vpop.f32.mrb[38].mxu0  ;;  %v3768_v22 = vpop.f32.mrb[38].mxu1 }
 0x225   : > { %v3051_v24 = vmax.f32 %v3038_v3, 0.0  ;;  %v3146_v25 = vmax.f32 %v3133_v29, 0.0  ;;  %v3745_v5 = vpop.f32.mrb[39].mxu0  ;;  %v3769_v18 = vpop.f32.mrb[39].mxu1 }
 0x226   : > { %v3159_v7 = vsel %vm3158_vm2, %v5114_v19, -inf  ;;  %v3220_v44 = vsel %vm3158_vm2, %v5116_v1, -inf  ;;  %v3187_v58 = vrot.slane %v5114_v19, 1  ;;  %v5131_v16 = vadd.f32 %v3745_v5, %v3744_v9 }
 0x227   : > { %v3157_v8 = vmax.f32 %v5082_v12, %v3051_v24  ;;  %v3160_v33 = vmax.f32 %v5089_v23, %v3159_v7  ;;  %v3219_v38 = vmax.f32 %v5084_v17, %v3146_v25  ;;  %v3221_v47 = vmax.f32 %v5092_v28, %v3220_v44 }
 0x228   : > { %v5133_v12 = vadd.f32 %v3769_v18, %v3768_v22  ;;  %v3248_v55 = vrot.slane %v5116_v1, 1  ;;  %v3189_v43 = vmax.f32 %v5114_v19, %v3187_v58  ;;  %v3184_v51 = vrot.slane %v5114_v19, 2 }
 0x229   : > { %v3161_v53 = vmax.f32 %v3160_v33, %v3155_v37  ;;  %v3162_v56 = vmax.f32 %v3156_v0, %v3157_v8  ;;  %v3223_v2 = vmax.f32 %v3218_v6, %v3219_v38  ;;  %v3222_v10 = vmax.f32 %v3221_v47, %v3217_v39 }
 0x22a   : > { %v3747_v11 = vpop.f32.mrb[40].mxu0  ;;  %v3771_v13 = vpop.f32.mrb[40].mxu1  ;;  %v3250_v46 = vmax.f32 %v5116_v1, %v3248_v55  ;;  %v3245_v6 = vrot.slane %v5116_v1, 2  ;;  %v5148_v54 = vmax.f32 %v3189_v43, %v3184_v51  ;;  %v3196_v4 = vrot.slane %v5114_v19, 3 }
 0x22b   : > { %v3163_v15 = vmax.f32 %v3161_v53, %v3162_v56  ;;  %v3748_v23 = vpop.f32.mrb[41].mxu0  ;;  %v3772_v17 = vpop.f32.mrb[41].mxu1  ;;  %v3224_v60 = vmax.f32 %v3222_v10, %v3223_v2  ;;  %v3257_v25 = vrot.slane %v5116_v1, 3 }
 0x22c   : > { %v3750_v57 = vpop.f32.mrb[42].mxu0  ;;  %v3774_v28 = vpop.f32.mrb[42].mxu1  ;;  %v5136_v48 = vadd.f32 %v3748_v23, %v3747_v11  ;;  %v5138_v31 = vadd.f32 %v3772_v17, %v3771_v13  ;;  %v5150_v35 = vmax.f32 %v3250_v46, %v3245_v6  ;;  %v3198_v7 = vmax.f32 %v5148_v54, %v3196_v4 }
 0x22d   : > { %v3164_v27 = vrot.slane %v3163_v15, 4  ;;  %v3751_v30 = vpop.f32.mrb[43].mxu0  ;;  %v3775_v32 = vpop.f32.mrb[43].mxu1  ;;  %v3225_v34 = vrot.slane %v3224_v60, 4  ;;  %v3191_v23 = vrot.slane %v3189_v43, 1  ;;  %v3252_v55 = vrot.slane %v3250_v46, 1 }
 0x22e   : > { %v5140_v37 = vadd.f32 %v3751_v30, %v3750_v57  ;;  %v5142_v39 = vadd.f32 %v3775_v32, %v3774_v28  ;;  %v3259_v33 = vmax.f32 %v5150_v35, %v3257_v25 }
 0x22f   : > { %v3165_v41 = vmax.f32 %v3163_v15, %v3164_v27  ;;  %v3226_v45 = vmax.f32 %v3224_v60, %v3225_v34 }
 0x231   : > { %v3166_v50 = vrot.slane %v3165_v41, 2  ;;  %v3227_v0 = vrot.slane %v3226_v45, 2 }
 0x232   : > { %v3753_v40 = vpop.f32.mrb[44].mxu0  ;;  %v3777_v52 = vpop.f32.mrb[44].mxu1 }
 0x233   : > { %v3167_v42 = vmax.f32 %v3165_v41, %v3166_v50  ;;  %v3754_v61 = vpop.f32.mrb[45].mxu0  ;;  %v3778_v63 = vpop.f32.mrb[45].mxu1  ;;  %v3228_v20 = vmax.f32 %v3226_v45, %v3227_v0 }
 0x234   : > { %v5152_v36 = vadd.f32 %v3754_v61, %v3753_v40  ;;  %v3756_v62 = vpop.f32.mrb[46].mxu0  ;;  %v5154_v3 = vadd.f32 %v3778_v63, %v3777_v52  ;;  %v3780_v29 = vpop.f32.mrb[46].mxu1 }
 0x235   : > { %v3168_v49 = vrot.slane %v3167_v42, 1  ;;  %v3757_v9 = vpop.f32.mrb[47].mxu0  ;;  %v3781_v22 = vpop.f32.mrb[47].mxu1  ;;  %v3229_v24 = vrot.slane %v3228_v20, 1 }
 0x236   : > { %v5158_v5 = vadd.f32 %v3757_v9, %v3756_v62 }
 0x237   : > { %v3169_v18 = vmax.f32 %v3167_v42, %v3168_v49  ;;  %v3230_v8 = vmax.f32 %v3228_v20, %v3229_v24  ;;  %v5191_v24 = vld [vmem:[%s5301_s2 + $0x2] ss:$0 sm:$0xff] }
 0x239   : > { %v3170_v38 = vmax.f32 %v5038_v14, %v3169_v18  ;;  %v3199_v44 = vmax.f32 %v3169_v18, %v3198_v7  ;;  %v5164_v47 = vmax.f32 %v5040_v26, %v3230_v8  ;;  %v3260_v19 = vmax.f32 %v3230_v8, %v3259_v33 }
 0x23a   : > { %v3759_v53 = vpop.f32.mrb[48].mxu0 }
 0x23b   : > { %v3172_v56 = vrot.slane %v3170_v38, 1  ;;  %v3195_v1 = vmax.f32 %v3170_v38, %v5148_v54  ;;  %v3760_v2 = vpop.f32.mrb[49].mxu0  ;;  %v3233_v10 = vrot.slane %v5164_v47, 1  ;;  %v3256_v11 = vmax.f32 %v5164_v47, %v5150_v35 }
 0x23c   : > { %v5170_v13 = vadd.f32 %v3760_v2, %v3759_v53  ;;  %v3762_v15 = vpop.f32.mrb[50].mxu0  ;;  %v3201_v22 = vrot.slane %v3199_v44, 7  ;;  %v3262_v7 = vrot.slane %v3260_v19, 7 }
 0x23d   : > { %v3174_v58 = vmax.f32 %v5038_v14, %v3172_v56  ;;  %v3763_v17 = vpop.f32.mrb[51].mxu0  ;;  %v3235_v60 = vmax.f32 %v5040_v26, %v3233_v10 }
 0x23e   : > { %v5175_v57 = vadd.f32 %v3763_v17, %v3762_v15 }
 0x23f   : > { %v3176_v28 = vrot.slane %v3174_v58, 1  ;;  %v3193_v27 = vmax.f32 %v3174_v58, %v3191_v23  ;;  %v3237_v30 = vrot.slane %v3235_v60, 1  ;;  %v3254_v32 = vmax.f32 %v3235_v60, %v3252_v55 }
 0x241   : > { %v3178_v34 = vmax.f32 %v5038_v14, %v3176_v28  ;;  %v3239_v41 = vmax.f32 %v5040_v26, %v3237_v30 }
 0x242   : > { %v3799_v45 = vpop.f32.mrb[48].mxu1  ;;  %v3857_v43 = vpop.f32.mrb[52].mxu0 }
 0x243   : > { %v3180_v50 = vrot.slane %v3178_v34, 1  ;;  %v3186_v0 = vmax.f32 %v3178_v34, %v3184_v51  ;;  %v3800_v46 = vpop.f32.mrb[49].mxu1  ;;  %v3858_v40 = vpop.f32.mrb[53].mxu0  ;;  %v3241_v52 = vrot.slane %v3239_v41, 1  ;;  %v3247_v42 = vmax.f32 %v3239_v41, %v3245_v6 }
 0x244   : > { %v3801_v54 = vadd.f32 %v3800_v46, %v3799_v45  ;;  %v3802_v61 = vpop.f32.mrb[50].mxu1  ;;  %v3859_v63 = vadd.f32 %v3858_v40, %v3857_v43  ;;  %v3860_v20 = vpop.f32.mrb[54].mxu0 }
 0x245   : > { %v3182_v35 = vmax.f32 %v5038_v14, %v3180_v50  ;;  %v3803_v62 = vpop.f32.mrb[51].mxu1  ;;  %v3861_v29 = vpop.f32.mrb[55].mxu0  ;;  %v3243_v49 = vmax.f32 %v5040_v26, %v3241_v52 }
 0x246   : > { %v2785_v51 = vadd.f32 %v3801_v54, %v5118_v21  ;;  %v3804_v4 = vadd.f32 %v3803_v62, %v3802_v61  ;;  %v3862_v9 = vadd.f32 %v3861_v29, %v3860_v20 }
 0x247   : > { %v3204_v6 = vsel %vm3203_vm3, %v3182_v35, %v3186_v0  ;;  %v3264_v26 = vsel %vm3203_vm3, %v3243_v49, %v3247_v42 }
 0x248   : > { %v3206_v14 = vsel %vm3205_vm4, %v3204_v6, %v3193_v27  ;;  %v2873_v21 = vadd.f32 %v3859_v63, %v2785_v51  ;;  %v2788_v25 = vadd.f32 %v3804_v4, %v5131_v16  ;;  %v3265_v8 = vsel %vm3205_vm4, %v3264_v26, %v3254_v32 }
 0x249   : > { %v3207_v18 = vsel %vm3158_vm2, %v3206_v14, %v3195_v1  ;;  %v3266_v38 = vsel %vm3158_vm2, %v3265_v8, %v3256_v11 }
 0x24a   : > { %v3209_v33 = vsel %vm3208_vm5, %v3207_v18, %v3201_v22  ;;  %v2931_v44 = vadd.f32 %v5191_v24, %v2873_v21  ;;  %v2876_v47 = vadd.f32 %v3862_v9, %v2788_v25  ;;  %v3805_v53 = vpop.f32.mrb[52].mxu1  ;;  %v3863_v56 = vpop.f32.mrb[56].mxu0  ;;  %v3267_v16 = vsel %vm3208_vm5, %v3266_v38, %v3262_v7 }
 0x24b   : > { %3210 = vst [vmem:[%s274_s17] sm:$0x1f] %v3209_v33  ;;  %v3806_v1 = vpop.f32.mrb[53].mxu1  ;;  %v3864_v2 = vpop.f32.mrb[57].mxu0  ;;  %3268 = vst [vmem:[%s278_s29] sm:$0x1f] %v3267_v16 }
 0x24c   : > { %2944 = vst [vmem:[%s5210_s24] sm:$0xff] %v2931_v44  ;;  %v2932_v19 = vadd.f32 %v5191_v24, %v2876_v47  ;;  %v3807_v10 = vadd.f32 %v3806_v1, %v3805_v53  ;;  %v3808_v11 = vpop.f32.mrb[54].mxu1  ;;  %v3865_v15 = vadd.f32 %v3864_v2, %v3863_v56  ;;  %v3866_v58 = vpop.f32.mrb[58].mxu0 }
 0x24d   : > { %v3809_v23 = vpop.f32.mrb[55].mxu1  ;;  %v3867_v17 = vpop.f32.mrb[59].mxu0 }
 0x24e   : > { %2945 = vst [vmem:[%s5210_s24 + $0x8] sm:$0xff] %v2932_v19  ;;  %v2793_v60 = vadd.f32 %v3807_v10, %v5136_v48  ;;  %v3810_v55 = vadd.f32 %v3809_v23, %v3808_v11  ;;  %v3868_v28 = vadd.f32 %v3867_v17, %v3866_v58 }
 0x250   : > { %v2881_v27 = vadd.f32 %v3865_v15, %v2793_v60  ;;  %v2796_v30 = vadd.f32 %v3810_v55, %v5140_v37 }
 0x252   : > { %v2933_v32 = vadd.f32 %v5191_v24, %v2881_v27  ;;  %v2884_v34 = vadd.f32 %v3868_v28, %v2796_v30  ;;  %v3811_v41 = vpop.f32.mrb[56].mxu1  ;;  %v3869_v45 = vpop.f32.mrb[60].mxu0 }
 0x253   : > { %v3812_v43 = vpop.f32.mrb[57].mxu1  ;;  %v3870_v50 = vpop.f32.mrb[61].mxu0 }
 0x254   : > { %2946 = vst [vmem:[%s5210_s24 + $0x10] sm:$0xff] %v2933_v32  ;;  %v2934_v0 = vadd.f32 %v5191_v24, %v2884_v34  ;;  %v3813_v46 = vadd.f32 %v3812_v43, %v3811_v41  ;;  %v3814_v40 = vpop.f32.mrb[58].mxu1  ;;  %v3871_v52 = vadd.f32 %v3870_v50, %v3869_v45  ;;  %v3872_v48 = vpop.f32.mrb[62].mxu0 }
 0x255   : > { %v3815_v42 = vpop.f32.mrb[59].mxu1  ;;  %v3873_v54 = vpop.f32.mrb[63].mxu0 }
 0x256   : > { %2947 = vst [vmem:[%s5210_s24 + $0x18] sm:$0xff] %v2934_v0  ;;  %v2801_v37 = vadd.f32 %v3813_v46, %v5152_v36  ;;  %v3816_v61 = vadd.f32 %v3815_v42, %v3814_v40  ;;  %v3874_v63 = vadd.f32 %v3873_v54, %v3872_v48 }
 0x258   : > { %v2889_v20 = vadd.f32 %v3871_v52, %v2801_v37  ;;  %v2804_v35 = vadd.f32 %v3816_v61, %v5158_v5 }
 0x25a   : > { %v2935_v62 = vadd.f32 %v5191_v24, %v2889_v20  ;;  %v2892_v29 = vadd.f32 %v3874_v63, %v2804_v35  ;;  %v3817_v49 = vpop.f32.mrb[60].mxu1  ;;  %v3875_v51 = vpop.f32.mrb[64].mxu0 }
 0x25b   : > { %v3818_v4 = vpop.f32.mrb[61].mxu1  ;;  %v3876_v9 = vpop.f32.mrb[65].mxu0 }
 0x25c   : > { %2948 = vst [vmem:[%s5210_s24 + $0x20] sm:$0xff] %v2935_v62  ;;  %v2936_v22 = vadd.f32 %v5191_v24, %v2892_v29  ;;  %v3819_v6 = vadd.f32 %v3818_v4, %v3817_v49  ;;  %v3820_v14 = vpop.f32.mrb[62].mxu1  ;;  %v3877_v26 = vadd.f32 %v3876_v9, %v3875_v51  ;;  %v3878_v36 = vpop.f32.mrb[66].mxu0 }
 0x25d   : > { %v3821_v21 = vpop.f32.mrb[63].mxu1  ;;  %v3879_v25 = vpop.f32.mrb[67].mxu0 }
 0x25e   : > { %2949 = vst [vmem:[%s5210_s24 + $0x28] sm:$0xff] %v2936_v22  ;;  %v2809_v5 = vadd.f32 %v3819_v6, %v5170_v13  ;;  %v3822_v18 = vadd.f32 %v3821_v21, %v3820_v14  ;;  %v3880_v7 = vadd.f32 %v3879_v25, %v3878_v36 }
 0x260   : > { %v2897_v8 = vadd.f32 %v3877_v26, %v2809_v5  ;;  %v2812_v33 = vadd.f32 %v3822_v18, %v5175_v57 }
 0x262   : > { %v2937_v38 = vadd.f32 %v5191_v24, %v2897_v8  ;;  %v2900_v44 = vadd.f32 %v3880_v7, %v2812_v33  ;;  %v3823_v47 = vpop.f32.mrb[64].mxu1  ;;  %v3881_v53 = vpop.f32.mrb[68].mxu0 }
 0x263   : > { %v3824_v56 = vpop.f32.mrb[65].mxu1  ;;  %v3882_v16 = vpop.f32.mrb[69].mxu0 }
 0x264   : > { %2950 = vst [vmem:[%s5210_s24 + $0x30] sm:$0xff] %v2937_v38  ;;  %v2938_v1 = vadd.f32 %v5191_v24, %v2900_v44  ;;  %v3825_v2 = vadd.f32 %v3824_v56, %v3823_v47  ;;  %v3826_v19 = vpop.f32.mrb[66].mxu1  ;;  %v3883_v10 = vadd.f32 %v3882_v16, %v3881_v53  ;;  %v3884_v13 = vpop.f32.mrb[70].mxu0 }
 0x265   : > { %v3827_v11 = vpop.f32.mrb[67].mxu1  ;;  %v3885_v15 = vpop.f32.mrb[71].mxu0 }
 0x266   : > { %2951 = vst [vmem:[%s5210_s24 + $0x38] sm:$0xff] %v2938_v1  ;;  %v2817_v57 = vadd.f32 %v3825_v2, %v5120_v59  ;;  %v3828_v58 = vadd.f32 %v3827_v11, %v3826_v19  ;;  %v3886_v23 = vadd.f32 %v3885_v15, %v3884_v13 }
 0x268   : > { %v2905_v17 = vadd.f32 %v3883_v10, %v2817_v57  ;;  %v2820_v60 = vadd.f32 %v3828_v58, %v5133_v12 }
 0x26a   : > { %v2939_v55 = vadd.f32 %v5191_v24, %v2905_v17  ;;  %v2908_v28 = vadd.f32 %v3886_v23, %v2820_v60  ;;  %v3829_v27 = vpop.f32.mrb[68].mxu1  ;;  %v3887_v30 = vpop.f32.mrb[72].mxu0 }
 0x26b   : > { %v3830_v32 = vpop.f32.mrb[69].mxu1  ;;  %v3888_v34 = vpop.f32.mrb[73].mxu0 }
 0x26c   : > { %2952 = vst [vmem:[%s5210_s24 + $0x40] sm:$0xff] %v2939_v55  ;;  %v2940_v41 = vadd.f32 %v5191_v24, %v2908_v28  ;;  %v3831_v45 = vadd.f32 %v3830_v32, %v3829_v27  ;;  %v3832_v43 = vpop.f32.mrb[70].mxu1  ;;  %v3889_v50 = vadd.f32 %v3888_v34, %v3887_v30  ;;  %v3890_v59 = vpop.f32.mrb[74].mxu0 }
 0x26d   : > { %v3833_v0 = vpop.f32.mrb[71].mxu1  ;;  %v3891_v46 = vpop.f32.mrb[75].mxu0 }
 0x26e   : > { %2953 = vst [vmem:[%s5210_s24 + $0x48] sm:$0xff] %v2940_v41  ;;  %v2825_v12 = vadd.f32 %v3831_v45, %v5138_v31  ;;  %v3834_v40 = vadd.f32 %v3833_v0, %v3832_v43  ;;  %v3892_v52 = vadd.f32 %v3891_v46, %v3890_v59 }
 0x270   : > { %v2913_v48 = vadd.f32 %v3889_v50, %v2825_v12  ;;  %v2828_v42 = vadd.f32 %v3834_v40, %v5142_v39 }
 0x272   : > { %v2941_v54 = vadd.f32 %v5191_v24, %v2913_v48  ;;  %v2916_v37 = vadd.f32 %v3892_v52, %v2828_v42  ;;  %v3835_v61 = vpop.f32.mrb[72].mxu1  ;;  %v3893_v63 = vpop.f32.mrb[76].mxu0 }
 0x273   : > { %v3836_v20 = vpop.f32.mrb[73].mxu1  ;;  %v3894_v35 = vpop.f32.mrb[77].mxu0 }
 0x274   : > { %2954 = vst [vmem:[%s5210_s24 + $0x50] sm:$0xff] %v2941_v54  ;;  %v2942_v62 = vadd.f32 %v5191_v24, %v2916_v37  ;;  %v3837_v31 = vadd.f32 %v3836_v20, %v3835_v61  ;;  %v3838_v29 = vpop.f32.mrb[74].mxu1  ;;  %v3895_v49 = vadd.f32 %v3894_v35, %v3893_v63  ;;  %v3896_v51 = vpop.f32.mrb[78].mxu0 }
 0x275   : > { %v3839_v39 = vpop.f32.mrb[75].mxu1  ;;  %v3897_v4 = vpop.f32.mrb[79].mxu0 }
 0x276   : > { %2955 = vst [vmem:[%s5210_s24 + $0x58] sm:$0xff] %v2942_v62  ;;  %v2833_v9 = vadd.f32 %v3837_v31, %v5154_v3 }
 0x278   : > { %v2921_v22 = vadd.f32 %v3895_v49, %v2833_v9 }
 0x27a   : > { %v2943_v6 = vadd.f32 %v5191_v24, %v2921_v22 }
 0x27c   : > { %2956 = vst [vmem:[%s5210_s24 + $0x60] sm:$0xff] %v2943_v6 }
 0x27d   : > { %4558 = shalt.err (!%p4555_p9)
}
 0x27e   : > { %s4559_s16 = scalar_lea.hbm %s5251_s15, 1664  ;;  %s4563_s11 = scalar_lea.hbm %s5304_s5, 3328 }
 0x27f   : > { %p4560_p2 = scmp.ne.s32.totalorder %s5251_s15, %s4559_s16  ;;  %p4564_p11 = scmp.lt.u32.totalorder %s5251_s15, %s5304_s5 }
 0x280   : > { %p4565_p1 = scmp.lt.u32.totalorder %s4563_s11, %s4559_s16  ;;  %p4567_p6 = scmp.lt.u32.totalorder %s4559_s16, %s5251_s15 }
 0x281   : > { %p4561_p0 = pnand %p4560_p2, %p4747_p12 }
 0x282   : > { %p4566_p4 = por %p4565_p1, %p4564_p11 }
 0x283   : > { %p4562_p5 = pneg %p4561_p0 }
 0x284   : > { %p4568_p8 = por %p4567_p6, %p4566_p4 }
 0x286   : > { %p4569_p10 = pnand %p4568_p8, %p4562_p5 }
 0x288   : > { %4572 = shalt.err (!%p4569_p10)
}
 0x289   : > { %s4624_s26 = smov 128   ;;  %s4625_s28 = smov 8  }
 0x28a   : > { %4022 = dma.vmem_to_hbm [thread:$0]  (%p4747_p12), %s5254_s14, 1664, %s5251_s15, %s3278_s10, %s4624_s26, %s4624_s26, %s4625_s28  }
 0x28b PF: > { %s3326_s7 = sand.u32 1, %s4603_s18   ;;  %p5319_p13 = scmp.ne.s32.totalorder %s5309_s25, 0 }
 0x28c   : > { %p5320_p3 = scmp.ge.s32.totalorder %s4615_s21, 2  ;;  %s3327_s22 = scalar_lea.sflag [#allocation4], %s3326_s7 }
 0x28e   : > { %p4033_p7 = pnand %p5320_p3, %p5319_p13 }
 0x290   : > { %4598 = dma.done.wait (!%p4033_p7), %s3327_s22, 1664  }
 0x291   : > { %4600 = vsyncadd (!%p4033_p7), %s3327_s22, 4294965632  ;;  %p20_p9 = scmp.ge.s32.totalorder %s4712_s30, 4   ;;  %s5321_s18 = smov %s4607_s19 }
 0x292   : > { %s5322_s19 = smov %s4611_s20  ;;  %s5323_s20 = smov %s4743_s8 }
 0x293   : > { %s5324_s21 = smov %s4712_s30  ;;  %22 = sbr.rel (!%p20_p9) target bundleno = 6 (0x6), region = 105 }
 0x29a   :  { %3332 = vsyncpa [#allocation3], 1 }
 0x29b   :  { %3334 = vsyncpa [#allocation3 + $0x1], 1 }
 0x29c   :  { %3335 = vsyncpa [#allocation6], 1 }
 0x29d   :  { %3336 = vsyncpa [#allocation4], 1 }
 0x29e   :  { %3338 = vsyncpa [#allocation4 + $0x1], 1 }

</bundles_post_ra>
